<compile_context>
chip_gen: v7x
topology: tpu7x:2x2x1
jax: 0.10.0
libtpu: 0.0.40
codegen_flags: <defaults>
</compile_context>

<pallas_src>
import math

import jax
import jax.numpy as jnp
from jax.experimental import pallas as pl
from jax.experimental.pallas import tpu as pltpu


# -----------------------------------------------------------------------------
# Fused kernel:
#   h   = LSTM_1(x)                      (hidden = H)
#   wl  = tanh(LSTM_2(tanh(h)))          -> (B, S)
#   emo = LeakyReLU_0.2(x @ We + be)     -> (S*B, E) time-major (fixed up in wrapper)
# -----------------------------------------------------------------------------
def decoder_kernel(xt_ref, wfused_ref, bfused_ref, whh1_ref,
                   wih2t_ref, whh2_ref, b2_ref,
                   emo_ref, wl_ref):
    B, S = wl_ref.shape
    H = whh1_ref.shape[0]
    G = 4 * H
    E = emo_ref.shape[1]

    # ---- Hoisted, fused input projection (LSTM-1 gates + emo classifier) ----
    # xt_ref is time-major (S*B, D); wfused = [wih1 | we], bfused = [b1 | be].
    proj = (jnp.dot(xt_ref[...], wfused_ref[...],
                    preferred_element_type=jnp.float32)
            + bfused_ref[...])                                     # (S*B, 4H+E)

    # emo classifier branch (independent of the recurrence): LeakyReLU(0.2)
    z = proj[:, G:G + E]
    emo_ref[...] = jnp.where(z >= 0.0, z, jnp.float32(0.2) * z)    # (S*B, E)

    # ---- One-EUP-pass gate trick: sigmoid(x) = 0.5*tanh(x/2) + 0.5 ----------
    # Pre-scale i/f/o lane blocks by 0.5 (g block by 1.0), folded into the
    # loop-invariant operands so the per-step critical chain gains no VPU op.
    lane = jax.lax.broadcasted_iota(jnp.int32, (1, G), 1)
    scale1 = jnp.where((lane >= 2 * H) & (lane < 3 * H),
                       jnp.float32(1.0), jnp.float32(0.5))          # (1, 4H)
    gi = (proj[:, 0:G] * scale1).reshape(S, B, G)                   # (S, B, 4H)
    whh1_s = whh1_ref[...] * scale1                                 # (H, 4H)

    gate_r = jax.lax.broadcasted_iota(jnp.int32, (4, 1), 0)
    scale2_col = jnp.where(gate_r == 2, jnp.float32(1.0), jnp.float32(0.5))
    gate_c = jax.lax.broadcasted_iota(jnp.int32, (1, 4), 1)
    scale2_row = jnp.where(gate_c == 2, jnp.float32(1.0), jnp.float32(0.5))
    wih2t_s = wih2t_ref[...] * scale2_col                           # (4, H)
    whh2_s = whh2_ref[...] * scale2_row                             # (1, 4)
    b2_s = b2_ref[...] * scale2_row                                 # (1, 4)

    h1 = jnp.zeros((B, H), jnp.float32)
    c1 = jnp.zeros((B, H), jnp.float32)
    h2 = jnp.zeros((B, 1), jnp.float32)
    c2 = jnp.zeros((B, 1), jnp.float32)

    # Static unroll over the small, static sequence length (S = 8).
    for t in range(S):
        # ---- LSTM 1 (gate order i, f, g, o); single tanh pass --------------
        g1s = gi[t] + jnp.dot(h1, whh1_s, preferred_element_type=jnp.float32)
        t1 = jnp.tanh(g1s)                       # tanh lanes (g block)
        u1 = 0.5 * t1 + 0.5                      # sigmoid lanes (i, f, o blocks)
        c1 = u1[:, H:2 * H] * c1 + u1[:, 0:H] * t1[:, 2 * H:3 * H]
        h1 = u1[:, 3 * H:4 * H] * jnp.tanh(c1)                      # (B, H)

        # ---- nn.Sequential(Tanh, LSTM_2) (hidden = 1) -----------------------
        h1t = jnp.tanh(h1)
        # (B,32)x(32,4) kept off the MXU: VPU broadcast-mul + XLU lane reduce.
        g2s = (jnp.sum(h1t[:, None, :] * wih2t_s[None, :, :], axis=-1)
               + h2 * whh2_s                     # (B,1)*(1,4) VPU broadcast
               + b2_s)                                               # (B, 4)
        t2 = jnp.tanh(g2s)
        u2 = 0.5 * t2 + 0.5
        c2 = u2[:, 1:2] * c2 + u2[:, 0:1] * t2[:, 2:3]
        h2 = u2[:, 3:4] * jnp.tanh(c2)                               # (B, 1)

        # final self.tanh on lstm_2 output -> write straight into the output
        wl_ref[:, t:t + 1] = jnp.tanh(h2)


# -----------------------------------------------------------------------------
# Wrapper: DECODER.forward
# -----------------------------------------------------------------------------
def decoder_forward(encodings_vec, params):
    x = encodings_vec.astype(jnp.float32)
    B, S, D = x.shape
    E = params["we"].shape[1]

    # Time-major 2D collapse in the wrapper (free XLA relayout, per review).
    xt2d = jnp.swapaxes(x, 0, 1).reshape(S * B, D)                  # (S*B, D)

    # Fuse [wih1 | we] and [b1 | be] once (one MXU weight push in the kernel).
    wfused = jnp.concatenate([params["wih1"], params["we"]], axis=1)  # (D, 4H+E)
    bfused = jnp.concatenate([params["b1"], params["be"]], axis=1)    # (1, 4H+E)
    wih2t = params["wih2"].T                                          # (4, H)

    vmem = pl.BlockSpec(memory_space=pltpu.MemorySpace.VMEM)

    emo_t, gen_word_len = pl.pallas_call(
        decoder_kernel,
        out_shape=(jax.ShapeDtypeStruct((S * B, E), jnp.float32),   # emo, time-major
                   jax.ShapeDtypeStruct((B, S), jnp.float32)),      # gen_word_len
        in_specs=[vmem] * 7,
        out_specs=(vmem, vmem),
    )(xt2d, wfused, bfused, params["whh1"], wih2t, params["whh2"], params["b2"])

    # nn.Flatten(): time-major (S*B,E) -> (B, S, E) -> (B, S*E)   (layout plumbing)
    gen_emotion = jnp.swapaxes(emo_t.reshape(S, B, E), 0, 1).reshape(B, S * E)
    return gen_emotion, gen_word_len


# -----------------------------------------------------------------------------
# Pure-JAX reference (same math, for correctness check)
# -----------------------------------------------------------------------------
def decoder_reference(x, params):
    B, S, D = x.shape
    H = params["whh1"].shape[0]
    E = params["we"].shape[1]

    def step(carry, x_t):
        h1, c1, h2, c2 = carry
        g1 = x_t @ params["wih1"] + h1 @ params["whh1"] + params["b1"]
        i1 = jax.nn.sigmoid(g1[:, 0:H]); f1 = jax.nn.sigmoid(g1[:, H:2 * H])
        gg1 = jnp.tanh(g1[:, 2 * H:3 * H]); o1 = jax.nn.sigmoid(g1[:, 3 * H:4 * H])
        c1 = f1 * c1 + i1 * gg1
        h1 = o1 * jnp.tanh(c1)
        h1t = jnp.tanh(h1)
        g2 = h1t @ params["wih2"] + h2 @ params["whh2"] + params["b2"]
        i2 = jax.nn.sigmoid(g2[:, 0:1]); f2 = jax.nn.sigmoid(g2[:, 1:2])
        gg2 = jnp.tanh(g2[:, 2:3]); o2 = jax.nn.sigmoid(g2[:, 3:4])
        c2 = f2 * c2 + i2 * gg2
        h2 = o2 * jnp.tanh(c2)
        return (h1, c1, h2, c2), jnp.tanh(h2)[:, 0]

    init = (jnp.zeros((B, H), jnp.float32), jnp.zeros((B, H), jnp.float32),
            jnp.zeros((B, 1), jnp.float32), jnp.zeros((B, 1), jnp.float32))
    _, wl = jax.lax.scan(step, init, jnp.swapaxes(x, 0, 1))
    gen_word_len = wl.T                                              # (B, S)

    z = x.reshape(B * S, D) @ params["we"] + params["be"]
    gen_emotion = jnp.where(z >= 0.0, z, 0.2 * z).reshape(B, S * E)
    return gen_emotion, gen_word_len


# -----------------------------------------------------------------------------
# Deterministic parameter init + smoke test
# -----------------------------------------------------------------------------
def init_params(key, in_dim, hidden, emo_dim):
    ks = jax.random.split(key, 8)

    def u(k, shape, scale):
        return jax.random.uniform(k, shape, jnp.float32, -scale, scale)

    k1 = 1.0 / math.sqrt(hidden)
    k2 = 1.0  # hidden_size = 1 for lstm_2
    kl = 1.0 / math.sqrt(in_dim)
    return {
        # LSTM 1 (input_size=in_dim, hidden=hidden); weights stored (in, 4H)
        "wih1": u(ks[0], (in_dim, 4 * hidden), k1),
        "whh1": u(ks[1], (hidden, 4 * hidden), k1),
        "b1":   u(ks[2], (1, 4 * hidden), k1),      # bias_ih + bias_hh combined
        # LSTM 2 (input_size=hidden, hidden=1)
        "wih2": u(ks[3], (hidden, 4), k2),
        "whh2": u(ks[4], (1, 4), k2),
        "b2":   u(ks[5], (1, 4), k2),
        # emo_classifier Linear(in_dim -> emo_dim); spec uses LeakyReLU(0.2)
        "we":   u(ks[6], (in_dim, emo_dim), kl),
        "be":   u(ks[7], (1, emo_dim), kl),
    }


if __name__ == "__main__":
    # args: text_dim=16, emo_dim=8, people_dim=8, filters=[32, 64]
    B, S = 2, 8
    text_dim, emo_dim, people_dim = 16, 8, 8
    filters = [32, 64]
    in_dim = text_dim + emo_dim + people_dim   # 32
    hidden = filters[0]                        # 32

    key = jax.random.PRNGKey(0)
    k_param, k_x = jax.random.split(key)
    params = init_params(k_param, in_dim, hidden, emo_dim)
    encodings_vec = jax.random.normal(k_x, (B, S, in_dim), jnp.float32)

    gen_emotion, gen_word_len = decoder_forward(encodings_vec, params)
    jax.block_until_ready((gen_emotion, gen_word_len))

    assert gen_emotion.shape == (B, S * emo_dim), gen_emotion.shape
    assert gen_word_len.shape == (B, S), gen_word_len.shape
    assert bool(jnp.all(jnp.isfinite(gen_emotion)))
    assert bool(jnp.all(jnp.isfinite(gen_word_len)))
    # gen_word_len passed through tanh -> must lie in [-1, 1]
    assert bool(jnp.all(jnp.abs(gen_word_len) <= 1.0))

    # Correctness vs pure-JAX reference (sigmoid-via-tanh merge is ulp-level).
    ref_emotion, ref_word_len = decoder_reference(encodings_vec, params)
    assert bool(jnp.allclose(gen_emotion, ref_emotion, atol=1e-3, rtol=1e-3))
    assert bool(jnp.allclose(gen_word_len, ref_word_len, atol=1e-3, rtol=1e-3))

    print("KERNEL_OK")
</pallas_src>

<mosaic_0001>
module attributes {stable_mosaic.version = 11 : i64} {
  func.func @decoder_kernel(%arg0: memref<16x32xf32, #tpu.memory_space<vmem>>, %arg1: memref<32x136xf32, #tpu.memory_space<vmem>>, %arg2: memref<1x136xf32, #tpu.memory_space<vmem>>, %arg3: memref<32x128xf32, #tpu.memory_space<vmem>>, %arg4: memref<4x32xf32, #tpu.memory_space<vmem>>, %arg5: memref<1x4xf32, #tpu.memory_space<vmem>>, %arg6: memref<1x4xf32, #tpu.memory_space<vmem>>, %arg7: memref<16x8xf32, #tpu.memory_space<vmem>>, %arg8: memref<2x8xf32, #tpu.memory_space<vmem>>) attributes {dimension_semantics = [], scalar_prefetch = 0 : i64, scratch_operands = 0 : i64, tpu.core_type = #tpu.core_type<tc>} {
    %c0 = arith.constant 0 : index
    %c0_0 = arith.constant 0 : index
    %0 = vector.load %arg0[%c0, %c0_0] : memref<16x32xf32, #tpu.memory_space<vmem>>, vector<16x32xf32>
    %c0_1 = arith.constant 0 : index
    %c0_2 = arith.constant 0 : index
    %1 = vector.load %arg1[%c0_1, %c0_2] : memref<32x136xf32, #tpu.memory_space<vmem>>, vector<32x136xf32>
    %cst = arith.constant dense<0.000000e+00> : vector<16x136xf32>
    %2 = tpu.matmul %0, %1, %cst {dimension_numbers = #tpu.dot_dimension_numbers<[1], [0], [0], [1], [0, 0, 1, 1], [], []>} : vector<16x32xf32>, vector<32x136xf32>, vector<16x136xf32> -> vector<16x136xf32>
    %c0_3 = arith.constant 0 : index
    %c0_4 = arith.constant 0 : index
    %3 = vector.load %arg2[%c0_3, %c0_4] : memref<1x136xf32, #tpu.memory_space<vmem>>, vector<1x136xf32>
    %4 = vector.broadcast %3 : vector<1x136xf32> to vector<16x136xf32>
    %5 = arith.addf %2, %4 : vector<16x136xf32>
    %6 = vector.extract_strided_slice %5 {offsets = [0, 128], sizes = [16, 8], strides = [1, 1]} : vector<16x136xf32> to vector<16x8xf32>
    %cst_5 = arith.constant 0.000000e+00 : f32
    %7 = vector.broadcast %cst_5 : f32 to vector<16x8xf32>
    %8 = arith.cmpf oge, %6, %7 : vector<16x8xf32>
    %cst_6 = arith.constant 2.000000e-01 : f32
    %9 = vector.broadcast %cst_6 : f32 to vector<16x8xf32>
    %10 = arith.mulf %9, %6 : vector<16x8xf32>
    %11 = arith.select %8, %6, %10 : vector<16x8xi1>, vector<16x8xf32>
    %c0_7 = arith.constant 0 : index
    %c0_8 = arith.constant 0 : index
    %12 = vector.load %arg7[%c0_7, %c0_8] : memref<16x8xf32, #tpu.memory_space<vmem>>, vector<16x8xf32>
    tpu.vector_store %arg7[%c0_7, %c0_8], %11 {strides = array<i32>} : memref<16x8xf32, #tpu.memory_space<vmem>>, vector<16x8xf32>,
    %13 = tpu.iota {dimensions = array<i32: 1>} : vector<1x128xi32>
    %c64_i32 = arith.constant 64 : i32
    %14 = vector.broadcast %c64_i32 : i32 to vector<1x128xi32>
    %15 = arith.cmpi sge, %13, %14 : vector<1x128xi32>
    %c96_i32 = arith.constant 96 : i32
    %16 = vector.broadcast %c96_i32 : i32 to vector<1x128xi32>
    %17 = arith.cmpi slt, %13, %16 : vector<1x128xi32>
    %18 = arith.andi %15, %17 : vector<1x128xi1>
    %cst_9 = arith.constant 1.000000e+00 : f32
    %cst_10 = arith.constant 5.000000e-01 : f32
    %19 = vector.broadcast %cst_9 : f32 to vector<1x128xf32>
    %20 = vector.broadcast %cst_10 : f32 to vector<1x128xf32>
    %21 = arith.select %18, %19, %20 : vector<1x128xi1>, vector<1x128xf32>
    %22 = vector.extract_strided_slice %5 {offsets = [0, 0], sizes = [16, 128], strides = [1, 1]} : vector<16x136xf32> to vector<16x128xf32>
    %23 = vector.broadcast %21 : vector<1x128xf32> to vector<16x128xf32>
    %24 = arith.mulf %22, %23 : vector<16x128xf32>
    %25 = vector.shape_cast %24 : vector<16x128xf32> to vector<8x2x128xf32>
    %c0_11 = arith.constant 0 : index
    %c0_12 = arith.constant 0 : index
    %26 = vector.load %arg3[%c0_11, %c0_12] : memref<32x128xf32, #tpu.memory_space<vmem>>, vector<32x128xf32>
    %27 = vector.broadcast %21 : vector<1x128xf32> to vector<32x128xf32>
    %28 = arith.mulf %26, %27 : vector<32x128xf32>
    %29 = tpu.iota {dimensions = array<i32: 0>} : vector<4x1xi32>
    %c2_i32 = arith.constant 2 : i32
    %30 = vector.broadcast %c2_i32 : i32 to vector<4x1xi32>
    %31 = arith.cmpi eq, %29, %30 : vector<4x1xi32>
    %cst_13 = arith.constant 1.000000e+00 : f32
    %cst_14 = arith.constant 5.000000e-01 : f32
    %32 = vector.broadcast %cst_13 : f32 to vector<4x1xf32>
    %33 = vector.broadcast %cst_14 : f32 to vector<4x1xf32>
    %34 = arith.select %31, %32, %33 : vector<4x1xi1>, vector<4x1xf32>
    %35 = tpu.iota {dimensions = array<i32: 1>} : vector<1x4xi32>
    %c2_i32_15 = arith.constant 2 : i32
    %36 = vector.broadcast %c2_i32_15 : i32 to vector<1x4xi32>
    %37 = arith.cmpi eq, %35, %36 : vector<1x4xi32>
    %cst_16 = arith.constant 1.000000e+00 : f32
    %cst_17 = arith.constant 5.000000e-01 : f32
    %38 = vector.broadcast %cst_16 : f32 to vector<1x4xf32>
    %39 = vector.broadcast %cst_17 : f32 to vector<1x4xf32>
    %40 = arith.select %37, %38, %39 : vector<1x4xi1>, vector<1x4xf32>
    %c0_18 = arith.constant 0 : index
    %c0_19 = arith.constant 0 : index
    %41 = vector.load %arg4[%c0_18, %c0_19] : memref<4x32xf32, #tpu.memory_space<vmem>>, vector<4x32xf32>
    %42 = vector.broadcast %34 : vector<4x1xf32> to vector<4x32xf32>
    %43 = arith.mulf %41, %42 : vector<4x32xf32>
    %c0_20 = arith.constant 0 : index
    %c0_21 = arith.constant 0 : index
    %44 = vector.load %arg5[%c0_20, %c0_21] : memref<1x4xf32, #tpu.memory_space<vmem>>, vector<1x4xf32>
    %45 = arith.mulf %44, %40 : vector<1x4xf32>
    %c0_22 = arith.constant 0 : index
    %c0_23 = arith.constant 0 : index
    %46 = vector.load %arg6[%c0_22, %c0_23] : memref<1x4xf32, #tpu.memory_space<vmem>>, vector<1x4xf32>
    %47 = arith.mulf %46, %40 : vector<1x4xf32>
    %cst_24 = arith.constant 0.000000e+00 : f32
    %48 = vector.broadcast %cst_24 : f32 to vector<2x32xf32>
    %cst_25 = arith.constant 0.000000e+00 : f32
    %49 = vector.broadcast %cst_25 : f32 to vector<2x32xf32>
    %cst_26 = arith.constant 0.000000e+00 : f32
    %50 = vector.broadcast %cst_26 : f32 to vector<2x1xf32>
    %cst_27 = arith.constant 0.000000e+00 : f32
    %51 = vector.broadcast %cst_27 : f32 to vector<2x1xf32>
    %52 = vector.extract_strided_slice %25 {offsets = [0, 0, 0], sizes = [1, 2, 128], strides = [1, 1, 1]} : vector<8x2x128xf32> to vector<1x2x128xf32>
    %53 = vector.shape_cast %52 : vector<1x2x128xf32> to vector<2x128xf32>
    %cst_28 = arith.constant dense<0.000000e+00> : vector<2x128xf32>
    %54 = tpu.matmul %48, %28, %cst_28 {dimension_numbers = #tpu.dot_dimension_numbers<[1], [0], [0], [1], [0, 0, 1, 1], [], []>} : vector<2x32xf32>, vector<32x128xf32>, vector<2x128xf32> -> vector<2x128xf32>
    %55 = arith.addf %53, %54 : vector<2x128xf32>
    %56 = math.tanh %55 : vector<2x128xf32>
    %cst_29 = arith.constant 5.000000e-01 : f32
    %57 = vector.broadcast %cst_29 : f32 to vector<2x128xf32>
    %58 = arith.mulf %57, %56 : vector<2x128xf32>
    %cst_30 = arith.constant 5.000000e-01 : f32
    %59 = vector.broadcast %cst_30 : f32 to vector<2x128xf32>
    %60 = arith.addf %58, %59 : vector<2x128xf32>
    %61 = vector.extract_strided_slice %60 {offsets = [0, 32], sizes = [2, 32], strides = [1, 1]} : vector<2x128xf32> to vector<2x32xf32>
    %62 = arith.mulf %61, %49 : vector<2x32xf32>
    %63 = vector.extract_strided_slice %60 {offsets = [0, 0], sizes = [2, 32], strides = [1, 1]} : vector<2x128xf32> to vector<2x32xf32>
    %64 = vector.extract_strided_slice %56 {offsets = [0, 64], sizes = [2, 32], strides = [1, 1]} : vector<2x128xf32> to vector<2x32xf32>
    %65 = arith.mulf %63, %64 : vector<2x32xf32>
    %66 = arith.addf %62, %65 : vector<2x32xf32>
    %67 = vector.extract_strided_slice %60 {offsets = [0, 96], sizes = [2, 32], strides = [1, 1]} : vector<2x128xf32> to vector<2x32xf32>
    %68 = math.tanh %66 : vector<2x32xf32>
    %69 = arith.mulf %67, %68 : vector<2x32xf32>
    %70 = math.tanh %69 : vector<2x32xf32>
    %71 = vector.shape_cast %70 : vector<2x32xf32> to vector<2x1x32xf32>
    %72 = vector.shape_cast %43 : vector<4x32xf32> to vector<1x4x32xf32>
    %73 = vector.broadcast %71 : vector<2x1x32xf32> to vector<2x4x32xf32>
    %74 = vector.broadcast %72 : vector<1x4x32xf32> to vector<2x4x32xf32>
    %75 = arith.mulf %73, %74 : vector<2x4x32xf32>
    %cst_31 = arith.constant dense<0.000000e+00> : vector<2x4xf32>
    %76 = vector.multi_reduction <add>, %75, %cst_31 [2] : vector<2x4x32xf32> to vector<2x4xf32>
    %77 = vector.broadcast %50 : vector<2x1xf32> to vector<2x4xf32>
    %78 = vector.broadcast %45 : vector<1x4xf32> to vector<2x4xf32>
    %79 = arith.mulf %77, %78 : vector<2x4xf32>
    %80 = arith.addf %76, %79 : vector<2x4xf32>
    %81 = vector.broadcast %47 : vector<1x4xf32> to vector<2x4xf32>
    %82 = arith.addf %80, %81 : vector<2x4xf32>
    %83 = math.tanh %82 : vector<2x4xf32>
    %cst_32 = arith.constant 5.000000e-01 : f32
    %84 = vector.broadcast %cst_32 : f32 to vector<2x4xf32>
    %85 = arith.mulf %84, %83 : vector<2x4xf32>
    %cst_33 = arith.constant 5.000000e-01 : f32
    %86 = vector.broadcast %cst_33 : f32 to vector<2x4xf32>
    %87 = arith.addf %85, %86 : vector<2x4xf32>
    %88 = vector.extract_strided_slice %87 {offsets = [0, 1], sizes = [2, 1], strides = [1, 1]} : vector<2x4xf32> to vector<2x1xf32>
    %89 = arith.mulf %88, %51 : vector<2x1xf32>
    %90 = vector.extract_strided_slice %87 {offsets = [0, 0], sizes = [2, 1], strides = [1, 1]} : vector<2x4xf32> to vector<2x1xf32>
    %91 = vector.extract_strided_slice %83 {offsets = [0, 2], sizes = [2, 1], strides = [1, 1]} : vector<2x4xf32> to vector<2x1xf32>
    %92 = arith.mulf %90, %91 : vector<2x1xf32>
    %93 = arith.addf %89, %92 : vector<2x1xf32>
    %94 = vector.extract_strided_slice %87 {offsets = [0, 3], sizes = [2, 1], strides = [1, 1]} : vector<2x4xf32> to vector<2x1xf32>
    %95 = math.tanh %93 : vector<2x1xf32>
    %96 = arith.mulf %94, %95 : vector<2x1xf32>
    %97 = math.tanh %96 : vector<2x1xf32>
    %c0_34 = arith.constant 0 : index
    %c0_35 = arith.constant 0 : index
    %98 = vector.load %arg8[%c0_34, %c0_35] : memref<2x8xf32, #tpu.memory_space<vmem>>, vector<2x1xf32>
    tpu.vector_store %arg8[%c0_34, %c0_35], %97 {strides = array<i32>} : memref<2x8xf32, #tpu.memory_space<vmem>>, vector<2x1xf32>,
    %99 = vector.extract_strided_slice %25 {offsets = [1, 0, 0], sizes = [1, 2, 128], strides = [1, 1, 1]} : vector<8x2x128xf32> to vector<1x2x128xf32>
    %100 = vector.shape_cast %99 : vector<1x2x128xf32> to vector<2x128xf32>
    %cst_36 = arith.constant dense<0.000000e+00> : vector<2x128xf32>
    %101 = tpu.matmul %69, %28, %cst_36 {dimension_numbers = #tpu.dot_dimension_numbers<[1], [0], [0], [1], [0, 0, 1, 1], [], []>} : vector<2x32xf32>, vector<32x128xf32>, vector<2x128xf32> -> vector<2x128xf32>
    %102 = arith.addf %100, %101 : vector<2x128xf32>
    %103 = math.tanh %102 : vector<2x128xf32>
    %cst_37 = arith.constant 5.000000e-01 : f32
    %104 = vector.broadcast %cst_37 : f32 to vector<2x128xf32>
    %105 = arith.mulf %104, %103 : vector<2x128xf32>
    %cst_38 = arith.constant 5.000000e-01 : f32
    %106 = vector.broadcast %cst_38 : f32 to vector<2x128xf32>
    %107 = arith.addf %105, %106 : vector<2x128xf32>
    %108 = vector.extract_strided_slice %107 {offsets = [0, 32], sizes = [2, 32], strides = [1, 1]} : vector<2x128xf32> to vector<2x32xf32>
    %109 = arith.mulf %108, %66 : vector<2x32xf32>
    %110 = vector.extract_strided_slice %107 {offsets = [0, 0], sizes = [2, 32], strides = [1, 1]} : vector<2x128xf32> to vector<2x32xf32>
    %111 = vector.extract_strided_slice %103 {offsets = [0, 64], sizes = [2, 32], strides = [1, 1]} : vector<2x128xf32> to vector<2x32xf32>
    %112 = arith.mulf %110, %111 : vector<2x32xf32>
    %113 = arith.addf %109, %112 : vector<2x32xf32>
    %114 = vector.extract_strided_slice %107 {offsets = [0, 96], sizes = [2, 32], strides = [1, 1]} : vector<2x128xf32> to vector<2x32xf32>
    %115 = math.tanh %113 : vector<2x32xf32>
    %116 = arith.mulf %114, %115 : vector<2x32xf32>
    %117 = math.tanh %116 : vector<2x32xf32>
    %118 = vector.shape_cast %117 : vector<2x32xf32> to vector<2x1x32xf32>
    %119 = vector.shape_cast %43 : vector<4x32xf32> to vector<1x4x32xf32>
    %120 = vector.broadcast %118 : vector<2x1x32xf32> to vector<2x4x32xf32>
    %121 = vector.broadcast %119 : vector<1x4x32xf32> to vector<2x4x32xf32>
    %122 = arith.mulf %120, %121 : vector<2x4x32xf32>
    %cst_39 = arith.constant dense<0.000000e+00> : vector<2x4xf32>
    %123 = vector.multi_reduction <add>, %122, %cst_39 [2] : vector<2x4x32xf32> to vector<2x4xf32>
    %124 = vector.broadcast %96 : vector<2x1xf32> to vector<2x4xf32>
    %125 = vector.broadcast %45 : vector<1x4xf32> to vector<2x4xf32>
    %126 = arith.mulf %124, %125 : vector<2x4xf32>
    %127 = arith.addf %123, %126 : vector<2x4xf32>
    %128 = vector.broadcast %47 : vector<1x4xf32> to vector<2x4xf32>
    %129 = arith.addf %127, %128 : vector<2x4xf32>
    %130 = math.tanh %129 : vector<2x4xf32>
    %cst_40 = arith.constant 5.000000e-01 : f32
    %131 = vector.broadcast %cst_40 : f32 to vector<2x4xf32>
    %132 = arith.mulf %131, %130 : vector<2x4xf32>
    %cst_41 = arith.constant 5.000000e-01 : f32
    %133 = vector.broadcast %cst_41 : f32 to vector<2x4xf32>
    %134 = arith.addf %132, %133 : vector<2x4xf32>
    %135 = vector.extract_strided_slice %134 {offsets = [0, 1], sizes = [2, 1], strides = [1, 1]} : vector<2x4xf32> to vector<2x1xf32>
    %136 = arith.mulf %135, %93 : vector<2x1xf32>
    %137 = vector.extract_strided_slice %134 {offsets = [0, 0], sizes = [2, 1], strides = [1, 1]} : vector<2x4xf32> to vector<2x1xf32>
    %138 = vector.extract_strided_slice %130 {offsets = [0, 2], sizes = [2, 1], strides = [1, 1]} : vector<2x4xf32> to vector<2x1xf32>
    %139 = arith.mulf %137, %138 : vector<2x1xf32>
    %140 = arith.addf %136, %139 : vector<2x1xf32>
    %141 = vector.extract_strided_slice %134 {offsets = [0, 3], sizes = [2, 1], strides = [1, 1]} : vector<2x4xf32> to vector<2x1xf32>
    %142 = math.tanh %140 : vector<2x1xf32>
    %143 = arith.mulf %141, %142 : vector<2x1xf32>
    %144 = math.tanh %143 : vector<2x1xf32>
    %c0_42 = arith.constant 0 : index
    %c1 = arith.constant 1 : index
    %145 = vector.load %arg8[%c0_42, %c1] : memref<2x8xf32, #tpu.memory_space<vmem>>, vector<2x1xf32>
    tpu.vector_store %arg8[%c0_42, %c1], %144 {strides = array<i32>} : memref<2x8xf32, #tpu.memory_space<vmem>>, vector<2x1xf32>,
    %146 = vector.extract_strided_slice %25 {offsets = [2, 0, 0], sizes = [1, 2, 128], strides = [1, 1, 1]} : vector<8x2x128xf32> to vector<1x2x128xf32>
    %147 = vector.shape_cast %146 : vector<1x2x128xf32> to vector<2x128xf32>
    %cst_43 = arith.constant dense<0.000000e+00> : vector<2x128xf32>
    %148 = tpu.matmul %116, %28, %cst_43 {dimension_numbers = #tpu.dot_dimension_numbers<[1], [0], [0], [1], [0, 0, 1, 1], [], []>} : vector<2x32xf32>, vector<32x128xf32>, vector<2x128xf32> -> vector<2x128xf32>
    %149 = arith.addf %147, %148 : vector<2x128xf32>
    %150 = math.tanh %149 : vector<2x128xf32>
    %cst_44 = arith.constant 5.000000e-01 : f32
    %151 = vector.broadcast %cst_44 : f32 to vector<2x128xf32>
    %152 = arith.mulf %151, %150 : vector<2x128xf32>
    %cst_45 = arith.constant 5.000000e-01 : f32
    %153 = vector.broadcast %cst_45 : f32 to vector<2x128xf32>
    %154 = arith.addf %152, %153 : vector<2x128xf32>
    %155 = vector.extract_strided_slice %154 {offsets = [0, 32], sizes = [2, 32], strides = [1, 1]} : vector<2x128xf32> to vector<2x32xf32>
    %156 = arith.mulf %155, %113 : vector<2x32xf32>
    %157 = vector.extract_strided_slice %154 {offsets = [0, 0], sizes = [2, 32], strides = [1, 1]} : vector<2x128xf32> to vector<2x32xf32>
    %158 = vector.extract_strided_slice %150 {offsets = [0, 64], sizes = [2, 32], strides = [1, 1]} : vector<2x128xf32> to vector<2x32xf32>
    %159 = arith.mulf %157, %158 : vector<2x32xf32>
    %160 = arith.addf %156, %159 : vector<2x32xf32>
    %161 = vector.extract_strided_slice %154 {offsets = [0, 96], sizes = [2, 32], strides = [1, 1]} : vector<2x128xf32> to vector<2x32xf32>
    %162 = math.tanh %160 : vector<2x32xf32>
    %163 = arith.mulf %161, %162 : vector<2x32xf32>
    %164 = math.tanh %163 : vector<2x32xf32>
    %165 = vector.shape_cast %164 : vector<2x32xf32> to vector<2x1x32xf32>
    %166 = vector.shape_cast %43 : vector<4x32xf32> to vector<1x4x32xf32>
    %167 = vector.broadcast %165 : vector<2x1x32xf32> to vector<2x4x32xf32>
    %168 = vector.broadcast %166 : vector<1x4x32xf32> to vector<2x4x32xf32>
    %169 = arith.mulf %167, %168 : vector<2x4x32xf32>
    %cst_46 = arith.constant dense<0.000000e+00> : vector<2x4xf32>
    %170 = vector.multi_reduction <add>, %169, %cst_46 [2] : vector<2x4x32xf32> to vector<2x4xf32>
    %171 = vector.broadcast %143 : vector<2x1xf32> to vector<2x4xf32>
    %172 = vector.broadcast %45 : vector<1x4xf32> to vector<2x4xf32>
    %173 = arith.mulf %171, %172 : vector<2x4xf32>
    %174 = arith.addf %170, %173 : vector<2x4xf32>
    %175 = vector.broadcast %47 : vector<1x4xf32> to vector<2x4xf32>
    %176 = arith.addf %174, %175 : vector<2x4xf32>
    %177 = math.tanh %176 : vector<2x4xf32>
    %cst_47 = arith.constant 5.000000e-01 : f32
    %178 = vector.broadcast %cst_47 : f32 to vector<2x4xf32>
    %179 = arith.mulf %178, %177 : vector<2x4xf32>
    %cst_48 = arith.constant 5.000000e-01 : f32
    %180 = vector.broadcast %cst_48 : f32 to vector<2x4xf32>
    %181 = arith.addf %179, %180 : vector<2x4xf32>
    %182 = vector.extract_strided_slice %181 {offsets = [0, 1], sizes = [2, 1], strides = [1, 1]} : vector<2x4xf32> to vector<2x1xf32>
    %183 = arith.mulf %182, %140 : vector<2x1xf32>
    %184 = vector.extract_strided_slice %181 {offsets = [0, 0], sizes = [2, 1], strides = [1, 1]} : vector<2x4xf32> to vector<2x1xf32>
    %185 = vector.extract_strided_slice %177 {offsets = [0, 2], sizes = [2, 1], strides = [1, 1]} : vector<2x4xf32> to vector<2x1xf32>
    %186 = arith.mulf %184, %185 : vector<2x1xf32>
    %187 = arith.addf %183, %186 : vector<2x1xf32>
    %188 = vector.extract_strided_slice %181 {offsets = [0, 3], sizes = [2, 1], strides = [1, 1]} : vector<2x4xf32> to vector<2x1xf32>
    %189 = math.tanh %187 : vector<2x1xf32>
    %190 = arith.mulf %188, %189 : vector<2x1xf32>
    %191 = math.tanh %190 : vector<2x1xf32>
    %c0_49 = arith.constant 0 : index
    %c2 = arith.constant 2 : index
    %192 = vector.load %arg8[%c0_49, %c2] : memref<2x8xf32, #tpu.memory_space<vmem>>, vector<2x1xf32>
    tpu.vector_store %arg8[%c0_49, %c2], %191 {strides = array<i32>} : memref<2x8xf32, #tpu.memory_space<vmem>>, vector<2x1xf32>,
    %193 = vector.extract_strided_slice %25 {offsets = [3, 0, 0], sizes = [1, 2, 128], strides = [1, 1, 1]} : vector<8x2x128xf32> to vector<1x2x128xf32>
    %194 = vector.shape_cast %193 : vector<1x2x128xf32> to vector<2x128xf32>
    %cst_50 = arith.constant dense<0.000000e+00> : vector<2x128xf32>
    %195 = tpu.matmul %163, %28, %cst_50 {dimension_numbers = #tpu.dot_dimension_numbers<[1], [0], [0], [1], [0, 0, 1, 1], [], []>} : vector<2x32xf32>, vector<32x128xf32>, vector<2x128xf32> -> vector<2x128xf32>
    %196 = arith.addf %194, %195 : vector<2x128xf32>
    %197 = math.tanh %196 : vector<2x128xf32>
    %cst_51 = arith.constant 5.000000e-01 : f32
    %198 = vector.broadcast %cst_51 : f32 to vector<2x128xf32>
    %199 = arith.mulf %198, %197 : vector<2x128xf32>
    %cst_52 = arith.constant 5.000000e-01 : f32
    %200 = vector.broadcast %cst_52 : f32 to vector<2x128xf32>
    %201 = arith.addf %199, %200 : vector<2x128xf32>
    %202 = vector.extract_strided_slice %201 {offsets = [0, 32], sizes = [2, 32], strides = [1, 1]} : vector<2x128xf32> to vector<2x32xf32>
    %203 = arith.mulf %202, %160 : vector<2x32xf32>
    %204 = vector.extract_strided_slice %201 {offsets = [0, 0], sizes = [2, 32], strides = [1, 1]} : vector<2x128xf32> to vector<2x32xf32>
    %205 = vector.extract_strided_slice %197 {offsets = [0, 64], sizes = [2, 32], strides = [1, 1]} : vector<2x128xf32> to vector<2x32xf32>
    %206 = arith.mulf %204, %205 : vector<2x32xf32>
    %207 = arith.addf %203, %206 : vector<2x32xf32>
    %208 = vector.extract_strided_slice %201 {offsets = [0, 96], sizes = [2, 32], strides = [1, 1]} : vector<2x128xf32> to vector<2x32xf32>
    %209 = math.tanh %207 : vector<2x32xf32>
    %210 = arith.mulf %208, %209 : vector<2x32xf32>
    %211 = math.tanh %210 : vector<2x32xf32>
    %212 = vector.shape_cast %211 : vector<2x32xf32> to vector<2x1x32xf32>
    %213 = vector.shape_cast %43 : vector<4x32xf32> to vector<1x4x32xf32>
    %214 = vector.broadcast %212 : vector<2x1x32xf32> to vector<2x4x32xf32>
    %215 = vector.broadcast %213 : vector<1x4x32xf32> to vector<2x4x32xf32>
    %216 = arith.mulf %214, %215 : vector<2x4x32xf32>
    %cst_53 = arith.constant dense<0.000000e+00> : vector<2x4xf32>
    %217 = vector.multi_reduction <add>, %216, %cst_53 [2] : vector<2x4x32xf32> to vector<2x4xf32>
    %218 = vector.broadcast %190 : vector<2x1xf32> to vector<2x4xf32>
    %219 = vector.broadcast %45 : vector<1x4xf32> to vector<2x4xf32>
    %220 = arith.mulf %218, %219 : vector<2x4xf32>
    %221 = arith.addf %217, %220 : vector<2x4xf32>
    %222 = vector.broadcast %47 : vector<1x4xf32> to vector<2x4xf32>
    %223 = arith.addf %221, %222 : vector<2x4xf32>
    %224 = math.tanh %223 : vector<2x4xf32>
    %cst_54 = arith.constant 5.000000e-01 : f32
    %225 = vector.broadcast %cst_54 : f32 to vector<2x4xf32>
    %226 = arith.mulf %225, %224 : vector<2x4xf32>
    %cst_55 = arith.constant 5.000000e-01 : f32
    %227 = vector.broadcast %cst_55 : f32 to vector<2x4xf32>
    %228 = arith.addf %226, %227 : vector<2x4xf32>
    %229 = vector.extract_strided_slice %228 {offsets = [0, 1], sizes = [2, 1], strides = [1, 1]} : vector<2x4xf32> to vector<2x1xf32>
    %230 = arith.mulf %229, %187 : vector<2x1xf32>
    %231 = vector.extract_strided_slice %228 {offsets = [0, 0], sizes = [2, 1], strides = [1, 1]} : vector<2x4xf32> to vector<2x1xf32>
    %232 = vector.extract_strided_slice %224 {offsets = [0, 2], sizes = [2, 1], strides = [1, 1]} : vector<2x4xf32> to vector<2x1xf32>
    %233 = arith.mulf %231, %232 : vector<2x1xf32>
    %234 = arith.addf %230, %233 : vector<2x1xf32>
    %235 = vector.extract_strided_slice %228 {offsets = [0, 3], sizes = [2, 1], strides = [1, 1]} : vector<2x4xf32> to vector<2x1xf32>
    %236 = math.tanh %234 : vector<2x1xf32>
    %237 = arith.mulf %235, %236 : vector<2x1xf32>
    %238 = math.tanh %237 : vector<2x1xf32>
    %c0_56 = arith.constant 0 : index
    %c3 = arith.constant 3 : index
    %239 = vector.load %arg8[%c0_56, %c3] : memref<2x8xf32, #tpu.memory_space<vmem>>, vector<2x1xf32>
    tpu.vector_store %arg8[%c0_56, %c3], %238 {strides = array<i32>} : memref<2x8xf32, #tpu.memory_space<vmem>>, vector<2x1xf32>,
    %240 = vector.extract_strided_slice %25 {offsets = [4, 0, 0], sizes = [1, 2, 128], strides = [1, 1, 1]} : vector<8x2x128xf32> to vector<1x2x128xf32>
    %241 = vector.shape_cast %240 : vector<1x2x128xf32> to vector<2x128xf32>
    %cst_57 = arith.constant dense<0.000000e+00> : vector<2x128xf32>
    %242 = tpu.matmul %210, %28, %cst_57 {dimension_numbers = #tpu.dot_dimension_numbers<[1], [0], [0], [1], [0, 0, 1, 1], [], []>} : vector<2x32xf32>, vector<32x128xf32>, vector<2x128xf32> -> vector<2x128xf32>
    %243 = arith.addf %241, %242 : vector<2x128xf32>
    %244 = math.tanh %243 : vector<2x128xf32>
    %cst_58 = arith.constant 5.000000e-01 : f32
    %245 = vector.broadcast %cst_58 : f32 to vector<2x128xf32>
    %246 = arith.mulf %245, %244 : vector<2x128xf32>
    %cst_59 = arith.constant 5.000000e-01 : f32
    %247 = vector.broadcast %cst_59 : f32 to vector<2x128xf32>
    %248 = arith.addf %246, %247 : vector<2x128xf32>
    %249 = vector.extract_strided_slice %248 {offsets = [0, 32], sizes = [2, 32], strides = [1, 1]} : vector<2x128xf32> to vector<2x32xf32>
    %250 = arith.mulf %249, %207 : vector<2x32xf32>
    %251 = vector.extract_strided_slice %248 {offsets = [0, 0], sizes = [2, 32], strides = [1, 1]} : vector<2x128xf32> to vector<2x32xf32>
    %252 = vector.extract_strided_slice %244 {offsets = [0, 64], sizes = [2, 32], strides = [1, 1]} : vector<2x128xf32> to vector<2x32xf32>
    %253 = arith.mulf %251, %252 : vector<2x32xf32>
    %254 = arith.addf %250, %253 : vector<2x32xf32>
    %255 = vector.extract_strided_slice %248 {offsets = [0, 96], sizes = [2, 32], strides = [1, 1]} : vector<2x128xf32> to vector<2x32xf32>
    %256 = math.tanh %254 : vector<2x32xf32>
    %257 = arith.mulf %255, %256 : vector<2x32xf32>
    %258 = math.tanh %257 : vector<2x32xf32>
    %259 = vector.shape_cast %258 : vector<2x32xf32> to vector<2x1x32xf32>
    %260 = vector.shape_cast %43 : vector<4x32xf32> to vector<1x4x32xf32>
    %261 = vector.broadcast %259 : vector<2x1x32xf32> to vector<2x4x32xf32>
    %262 = vector.broadcast %260 : vector<1x4x32xf32> to vector<2x4x32xf32>
    %263 = arith.mulf %261, %262 : vector<2x4x32xf32>
    %cst_60 = arith.constant dense<0.000000e+00> : vector<2x4xf32>
    %264 = vector.multi_reduction <add>, %263, %cst_60 [2] : vector<2x4x32xf32> to vector<2x4xf32>
    %265 = vector.broadcast %237 : vector<2x1xf32> to vector<2x4xf32>
    %266 = vector.broadcast %45 : vector<1x4xf32> to vector<2x4xf32>
    %267 = arith.mulf %265, %266 : vector<2x4xf32>
    %268 = arith.addf %264, %267 : vector<2x4xf32>
    %269 = vector.broadcast %47 : vector<1x4xf32> to vector<2x4xf32>
    %270 = arith.addf %268, %269 : vector<2x4xf32>
    %271 = math.tanh %270 : vector<2x4xf32>
    %cst_61 = arith.constant 5.000000e-01 : f32
    %272 = vector.broadcast %cst_61 : f32 to vector<2x4xf32>
    %273 = arith.mulf %272, %271 : vector<2x4xf32>
    %cst_62 = arith.constant 5.000000e-01 : f32
    %274 = vector.broadcast %cst_62 : f32 to vector<2x4xf32>
    %275 = arith.addf %273, %274 : vector<2x4xf32>
    %276 = vector.extract_strided_slice %275 {offsets = [0, 1], sizes = [2, 1], strides = [1, 1]} : vector<2x4xf32> to vector<2x1xf32>
    %277 = arith.mulf %276, %234 : vector<2x1xf32>
    %278 = vector.extract_strided_slice %275 {offsets = [0, 0], sizes = [2, 1], strides = [1, 1]} : vector<2x4xf32> to vector<2x1xf32>
    %279 = vector.extract_strided_slice %271 {offsets = [0, 2], sizes = [2, 1], strides = [1, 1]} : vector<2x4xf32> to vector<2x1xf32>
    %280 = arith.mulf %278, %279 : vector<2x1xf32>
    %281 = arith.addf %277, %280 : vector<2x1xf32>
    %282 = vector.extract_strided_slice %275 {offsets = [0, 3], sizes = [2, 1], strides = [1, 1]} : vector<2x4xf32> to vector<2x1xf32>
    %283 = math.tanh %281 : vector<2x1xf32>
    %284 = arith.mulf %282, %283 : vector<2x1xf32>
    %285 = math.tanh %284 : vector<2x1xf32>
    %c0_63 = arith.constant 0 : index
    %c4 = arith.constant 4 : index
    %286 = vector.load %arg8[%c0_63, %c4] : memref<2x8xf32, #tpu.memory_space<vmem>>, vector<2x1xf32>
    tpu.vector_store %arg8[%c0_63, %c4], %285 {strides = array<i32>} : memref<2x8xf32, #tpu.memory_space<vmem>>, vector<2x1xf32>,
    %287 = vector.extract_strided_slice %25 {offsets = [5, 0, 0], sizes = [1, 2, 128], strides = [1, 1, 1]} : vector<8x2x128xf32> to vector<1x2x128xf32>
    %288 = vector.shape_cast %287 : vector<1x2x128xf32> to vector<2x128xf32>
    %cst_64 = arith.constant dense<0.000000e+00> : vector<2x128xf32>
    %289 = tpu.matmul %257, %28, %cst_64 {dimension_numbers = #tpu.dot_dimension_numbers<[1], [0], [0], [1], [0, 0, 1, 1], [], []>} : vector<2x32xf32>, vector<32x128xf32>, vector<2x128xf32> -> vector<2x128xf32>
    %290 = arith.addf %288, %289 : vector<2x128xf32>
    %291 = math.tanh %290 : vector<2x128xf32>
    %cst_65 = arith.constant 5.000000e-01 : f32
    %292 = vector.broadcast %cst_65 : f32 to vector<2x128xf32>
    %293 = arith.mulf %292, %291 : vector<2x128xf32>
    %cst_66 = arith.constant 5.000000e-01 : f32
    %294 = vector.broadcast %cst_66 : f32 to vector<2x128xf32>
    %295 = arith.addf %293, %294 : vector<2x128xf32>
    %296 = vector.extract_strided_slice %295 {offsets = [0, 32], sizes = [2, 32], strides = [1, 1]} : vector<2x128xf32> to vector<2x32xf32>
    %297 = arith.mulf %296, %254 : vector<2x32xf32>
    %298 = vector.extract_strided_slice %295 {offsets = [0, 0], sizes = [2, 32], strides = [1, 1]} : vector<2x128xf32> to vector<2x32xf32>
    %299 = vector.extract_strided_slice %291 {offsets = [0, 64], sizes = [2, 32], strides = [1, 1]} : vector<2x128xf32> to vector<2x32xf32>
    %300 = arith.mulf %298, %299 : vector<2x32xf32>
    %301 = arith.addf %297, %300 : vector<2x32xf32>
    %302 = vector.extract_strided_slice %295 {offsets = [0, 96], sizes = [2, 32], strides = [1, 1]} : vector<2x128xf32> to vector<2x32xf32>
    %303 = math.tanh %301 : vector<2x32xf32>
    %304 = arith.mulf %302, %303 : vector<2x32xf32>
    %305 = math.tanh %304 : vector<2x32xf32>
    %306 = vector.shape_cast %305 : vector<2x32xf32> to vector<2x1x32xf32>
    %307 = vector.shape_cast %43 : vector<4x32xf32> to vector<1x4x32xf32>
    %308 = vector.broadcast %306 : vector<2x1x32xf32> to vector<2x4x32xf32>
    %309 = vector.broadcast %307 : vector<1x4x32xf32> to vector<2x4x32xf32>
    %310 = arith.mulf %308, %309 : vector<2x4x32xf32>
    %cst_67 = arith.constant dense<0.000000e+00> : vector<2x4xf32>
    %311 = vector.multi_reduction <add>, %310, %cst_67 [2] : vector<2x4x32xf32> to vector<2x4xf32>
    %312 = vector.broadcast %284 : vector<2x1xf32> to vector<2x4xf32>
    %313 = vector.broadcast %45 : vector<1x4xf32> to vector<2x4xf32>
    %314 = arith.mulf %312, %313 : vector<2x4xf32>
    %315 = arith.addf %311, %314 : vector<2x4xf32>
    %316 = vector.broadcast %47 : vector<1x4xf32> to vector<2x4xf32>
    %317 = arith.addf %315, %316 : vector<2x4xf32>
    %318 = math.tanh %317 : vector<2x4xf32>
    %cst_68 = arith.constant 5.000000e-01 : f32
    %319 = vector.broadcast %cst_68 : f32 to vector<2x4xf32>
    %320 = arith.mulf %319, %318 : vector<2x4xf32>
    %cst_69 = arith.constant 5.000000e-01 : f32
    %321 = vector.broadcast %cst_69 : f32 to vector<2x4xf32>
    %322 = arith.addf %320, %321 : vector<2x4xf32>
    %323 = vector.extract_strided_slice %322 {offsets = [0, 1], sizes = [2, 1], strides = [1, 1]} : vector<2x4xf32> to vector<2x1xf32>
    %324 = arith.mulf %323, %281 : vector<2x1xf32>
    %325 = vector.extract_strided_slice %322 {offsets = [0, 0], sizes = [2, 1], strides = [1, 1]} : vector<2x4xf32> to vector<2x1xf32>
    %326 = vector.extract_strided_slice %318 {offsets = [0, 2], sizes = [2, 1], strides = [1, 1]} : vector<2x4xf32> to vector<2x1xf32>
    %327 = arith.mulf %325, %326 : vector<2x1xf32>
    %328 = arith.addf %324, %327 : vector<2x1xf32>
    %329 = vector.extract_strided_slice %322 {offsets = [0, 3], sizes = [2, 1], strides = [1, 1]} : vector<2x4xf32> to vector<2x1xf32>
    %330 = math.tanh %328 : vector<2x1xf32>
    %331 = arith.mulf %329, %330 : vector<2x1xf32>
    %332 = math.tanh %331 : vector<2x1xf32>
    %c0_70 = arith.constant 0 : index
    %c5 = arith.constant 5 : index
    %333 = vector.load %arg8[%c0_70, %c5] : memref<2x8xf32, #tpu.memory_space<vmem>>, vector<2x1xf32>
    tpu.vector_store %arg8[%c0_70, %c5], %332 {strides = array<i32>} : memref<2x8xf32, #tpu.memory_space<vmem>>, vector<2x1xf32>,
    %334 = vector.extract_strided_slice %25 {offsets = [6, 0, 0], sizes = [1, 2, 128], strides = [1, 1, 1]} : vector<8x2x128xf32> to vector<1x2x128xf32>
    %335 = vector.shape_cast %334 : vector<1x2x128xf32> to vector<2x128xf32>
    %cst_71 = arith.constant dense<0.000000e+00> : vector<2x128xf32>
    %336 = tpu.matmul %304, %28, %cst_71 {dimension_numbers = #tpu.dot_dimension_numbers<[1], [0], [0], [1], [0, 0, 1, 1], [], []>} : vector<2x32xf32>, vector<32x128xf32>, vector<2x128xf32> -> vector<2x128xf32>
    %337 = arith.addf %335, %336 : vector<2x128xf32>
    %338 = math.tanh %337 : vector<2x128xf32>
    %cst_72 = arith.constant 5.000000e-01 : f32
    %339 = vector.broadcast %cst_72 : f32 to vector<2x128xf32>
    %340 = arith.mulf %339, %338 : vector<2x128xf32>
    %cst_73 = arith.constant 5.000000e-01 : f32
    %341 = vector.broadcast %cst_73 : f32 to vector<2x128xf32>
    %342 = arith.addf %340, %341 : vector<2x128xf32>
    %343 = vector.extract_strided_slice %342 {offsets = [0, 32], sizes = [2, 32], strides = [1, 1]} : vector<2x128xf32> to vector<2x32xf32>
    %344 = arith.mulf %343, %301 : vector<2x32xf32>
    %345 = vector.extract_strided_slice %342 {offsets = [0, 0], sizes = [2, 32], strides = [1, 1]} : vector<2x128xf32> to vector<2x32xf32>
    %346 = vector.extract_strided_slice %338 {offsets = [0, 64], sizes = [2, 32], strides = [1, 1]} : vector<2x128xf32> to vector<2x32xf32>
    %347 = arith.mulf %345, %346 : vector<2x32xf32>
    %348 = arith.addf %344, %347 : vector<2x32xf32>
    %349 = vector.extract_strided_slice %342 {offsets = [0, 96], sizes = [2, 32], strides = [1, 1]} : vector<2x128xf32> to vector<2x32xf32>
    %350 = math.tanh %348 : vector<2x32xf32>
    %351 = arith.mulf %349, %350 : vector<2x32xf32>
    %352 = math.tanh %351 : vector<2x32xf32>
    %353 = vector.shape_cast %352 : vector<2x32xf32> to vector<2x1x32xf32>
    %354 = vector.shape_cast %43 : vector<4x32xf32> to vector<1x4x32xf32>
    %355 = vector.broadcast %353 : vector<2x1x32xf32> to vector<2x4x32xf32>
    %356 = vector.broadcast %354 : vector<1x4x32xf32> to vector<2x4x32xf32>
    %357 = arith.mulf %355, %356 : vector<2x4x32xf32>
    %cst_74 = arith.constant dense<0.000000e+00> : vector<2x4xf32>
    %358 = vector.multi_reduction <add>, %357, %cst_74 [2] : vector<2x4x32xf32> to vector<2x4xf32>
    %359 = vector.broadcast %331 : vector<2x1xf32> to vector<2x4xf32>
    %360 = vector.broadcast %45 : vector<1x4xf32> to vector<2x4xf32>
    %361 = arith.mulf %359, %360 : vector<2x4xf32>
    %362 = arith.addf %358, %361 : vector<2x4xf32>
    %363 = vector.broadcast %47 : vector<1x4xf32> to vector<2x4xf32>
    %364 = arith.addf %362, %363 : vector<2x4xf32>
    %365 = math.tanh %364 : vector<2x4xf32>
    %cst_75 = arith.constant 5.000000e-01 : f32
    %366 = vector.broadcast %cst_75 : f32 to vector<2x4xf32>
    %367 = arith.mulf %366, %365 : vector<2x4xf32>
    %cst_76 = arith.constant 5.000000e-01 : f32
    %368 = vector.broadcast %cst_76 : f32 to vector<2x4xf32>
    %369 = arith.addf %367, %368 : vector<2x4xf32>
    %370 = vector.extract_strided_slice %369 {offsets = [0, 1], sizes = [2, 1], strides = [1, 1]} : vector<2x4xf32> to vector<2x1xf32>
    %371 = arith.mulf %370, %328 : vector<2x1xf32>
    %372 = vector.extract_strided_slice %369 {offsets = [0, 0], sizes = [2, 1], strides = [1, 1]} : vector<2x4xf32> to vector<2x1xf32>
    %373 = vector.extract_strided_slice %365 {offsets = [0, 2], sizes = [2, 1], strides = [1, 1]} : vector<2x4xf32> to vector<2x1xf32>
    %374 = arith.mulf %372, %373 : vector<2x1xf32>
    %375 = arith.addf %371, %374 : vector<2x1xf32>
    %376 = vector.extract_strided_slice %369 {offsets = [0, 3], sizes = [2, 1], strides = [1, 1]} : vector<2x4xf32> to vector<2x1xf32>
    %377 = math.tanh %375 : vector<2x1xf32>
    %378 = arith.mulf %376, %377 : vector<2x1xf32>
    %379 = math.tanh %378 : vector<2x1xf32>
    %c0_77 = arith.constant 0 : index
    %c6 = arith.constant 6 : index
    %380 = vector.load %arg8[%c0_77, %c6] : memref<2x8xf32, #tpu.memory_space<vmem>>, vector<2x1xf32>
    tpu.vector_store %arg8[%c0_77, %c6], %379 {strides = array<i32>} : memref<2x8xf32, #tpu.memory_space<vmem>>, vector<2x1xf32>,
    %381 = vector.extract_strided_slice %25 {offsets = [7, 0, 0], sizes = [1, 2, 128], strides = [1, 1, 1]} : vector<8x2x128xf32> to vector<1x2x128xf32>
    %382 = vector.shape_cast %381 : vector<1x2x128xf32> to vector<2x128xf32>
    %cst_78 = arith.constant dense<0.000000e+00> : vector<2x128xf32>
    %383 = tpu.matmul %351, %28, %cst_78 {dimension_numbers = #tpu.dot_dimension_numbers<[1], [0], [0], [1], [0, 0, 1, 1], [], []>} : vector<2x32xf32>, vector<32x128xf32>, vector<2x128xf32> -> vector<2x128xf32>
    %384 = arith.addf %382, %383 : vector<2x128xf32>
    %385 = math.tanh %384 : vector<2x128xf32>
    %cst_79 = arith.constant 5.000000e-01 : f32
    %386 = vector.broadcast %cst_79 : f32 to vector<2x128xf32>
    %387 = arith.mulf %386, %385 : vector<2x128xf32>
    %cst_80 = arith.constant 5.000000e-01 : f32
    %388 = vector.broadcast %cst_80 : f32 to vector<2x128xf32>
    %389 = arith.addf %387, %388 : vector<2x128xf32>
    %390 = vector.extract_strided_slice %389 {offsets = [0, 32], sizes = [2, 32], strides = [1, 1]} : vector<2x128xf32> to vector<2x32xf32>
    %391 = arith.mulf %390, %348 : vector<2x32xf32>
    %392 = vector.extract_strided_slice %389 {offsets = [0, 0], sizes = [2, 32], strides = [1, 1]} : vector<2x128xf32> to vector<2x32xf32>
    %393 = vector.extract_strided_slice %385 {offsets = [0, 64], sizes = [2, 32], strides = [1, 1]} : vector<2x128xf32> to vector<2x32xf32>
    %394 = arith.mulf %392, %393 : vector<2x32xf32>
    %395 = arith.addf %391, %394 : vector<2x32xf32>
    %396 = vector.extract_strided_slice %389 {offsets = [0, 96], sizes = [2, 32], strides = [1, 1]} : vector<2x128xf32> to vector<2x32xf32>
    %397 = math.tanh %395 : vector<2x32xf32>
    %398 = arith.mulf %396, %397 : vector<2x32xf32>
    %399 = math.tanh %398 : vector<2x32xf32>
    %400 = vector.shape_cast %399 : vector<2x32xf32> to vector<2x1x32xf32>
    %401 = vector.shape_cast %43 : vector<4x32xf32> to vector<1x4x32xf32>
    %402 = vector.broadcast %400 : vector<2x1x32xf32> to vector<2x4x32xf32>
    %403 = vector.broadcast %401 : vector<1x4x32xf32> to vector<2x4x32xf32>
    %404 = arith.mulf %402, %403 : vector<2x4x32xf32>
    %cst_81 = arith.constant dense<0.000000e+00> : vector<2x4xf32>
    %405 = vector.multi_reduction <add>, %404, %cst_81 [2] : vector<2x4x32xf32> to vector<2x4xf32>
    %406 = vector.broadcast %378 : vector<2x1xf32> to vector<2x4xf32>
    %407 = vector.broadcast %45 : vector<1x4xf32> to vector<2x4xf32>
    %408 = arith.mulf %406, %407 : vector<2x4xf32>
    %409 = arith.addf %405, %408 : vector<2x4xf32>
    %410 = vector.broadcast %47 : vector<1x4xf32> to vector<2x4xf32>
    %411 = arith.addf %409, %410 : vector<2x4xf32>
    %412 = math.tanh %411 : vector<2x4xf32>
    %cst_82 = arith.constant 5.000000e-01 : f32
    %413 = vector.broadcast %cst_82 : f32 to vector<2x4xf32>
    %414 = arith.mulf %413, %412 : vector<2x4xf32>
    %cst_83 = arith.constant 5.000000e-01 : f32
    %415 = vector.broadcast %cst_83 : f32 to vector<2x4xf32>
    %416 = arith.addf %414, %415 : vector<2x4xf32>
    %417 = vector.extract_strided_slice %416 {offsets = [0, 1], sizes = [2, 1], strides = [1, 1]} : vector<2x4xf32> to vector<2x1xf32>
    %418 = arith.mulf %417, %375 : vector<2x1xf32>
    %419 = vector.extract_strided_slice %416 {offsets = [0, 0], sizes = [2, 1], strides = [1, 1]} : vector<2x4xf32> to vector<2x1xf32>
    %420 = vector.extract_strided_slice %412 {offsets = [0, 2], sizes = [2, 1], strides = [1, 1]} : vector<2x4xf32> to vector<2x1xf32>
    %421 = arith.mulf %419, %420 : vector<2x1xf32>
    %422 = arith.addf %418, %421 : vector<2x1xf32>
    %423 = vector.extract_strided_slice %416 {offsets = [0, 3], sizes = [2, 1], strides = [1, 1]} : vector<2x4xf32> to vector<2x1xf32>
    %424 = math.tanh %422 : vector<2x1xf32>
    %425 = arith.mulf %423, %424 : vector<2x1xf32>
    %426 = math.tanh %425 : vector<2x1xf32>
    %c0_84 = arith.constant 0 : index
    %c7 = arith.constant 7 : index
    %427 = vector.load %arg8[%c0_84, %c7] : memref<2x8xf32, #tpu.memory_space<vmem>>, vector<2x1xf32>
    tpu.vector_store %arg8[%c0_84, %c7], %426 {strides = array<i32>} : memref<2x8xf32, #tpu.memory_space<vmem>>, vector<2x1xf32>,
    return
  }
}

</mosaic_0001>

<bundles_post_ra>
// kernel: tpu_custom_call.1
= control target key start
LH: loop header
LB: loop body
LE: loop exit
PB: predicated region body
PF: predicated region fallthrough
CT: control target
= control target key end

     0   :  { %14 = vsyncpa [#allocation3], 0  ;;  %s2821_s0 = inlined_call_operand.hbm [shape: f32[16,32], index: 0, kind: input, shape index: {}]   ;;  %s2822_s1 = inlined_call_operand.hbm [shape: f32[32,136], index: 1, kind: input, shape index: {}]   ;;  %s2823_s2 = inlined_call_operand.vmem [shape: f32[1,136], index: 2, kind: input, shape index: {}]   ;;  %s2824_s3 = inlined_call_operand.hbm [shape: f32[32,128], index: 3, kind: input, shape index: {}]   ;;  %s2825_s4 = inlined_call_operand.vmem [shape: f32[4,32], index: 4, kind: input, shape index: {}]   ;;  %s2826_s5 = inlined_call_operand.vmem [shape: f32[1,4], index: 5, kind: input, shape index: {}]   ;;  %s2827_s6 = inlined_call_operand.vmem [shape: f32[1,4], index: 6, kind: input, shape index: {}]   ;;  %s2828_s7 = inlined_call_operand.vmem [shape: f32[16,8], index: 7, kind: output, shape index: {0}]   ;;  %s2829_s8 = inlined_call_operand.hbm [shape: f32[2,8], index: 8, kind: output, shape index: {1}]  }
   0x1   :  { %15 = vsyncpa [#allocation6], 0 }
   0x2   :  { %16 = vsyncpa [#allocation4], 0  ;;  %s2326_s27 = smov [#allocation5]   ;;  %s2232_s9 = scalar_lea.hbm %s2822_s1, 1024 }
   0x3   :  { %s34_s28 = sshll.u32 %s2326_s27, 4  ;;  %p2233_p0 = scmp.ne.s32.totalorder %s2822_s1, %s2232_s9  ;;  %s35_s28 = int_to_ptr.vmem [resolvable:$true] %s34_s28 }
   0x4   :  { %p2236_p1 = scmp.lt.u32.totalorder %s2232_s9, %s2822_s1 }
   0x6   :  { %p2238_p2 = pnand %p2236_p1, %p2233_p0 }
   0x8   :  { %2241 = shalt.err (!%p2238_p2)
}
   0x9   :  { %s2242_s14 = scalar_lea.vmem %s35_s28, 1024  ;;  %p2247_p4 = scmp.lt.s32.totalorder %s35_s28, %s35_s28 }
   0xa   :  { %p2243_p3 = scmp.ne.s32.totalorder %s35_s28, %s2242_s14  ;;  %p2248_p5 = scmp.lt.s32.totalorder %s2242_s14, %s2242_s14 }
   0xc   :  { %p2249_p6 = por %p2248_p5, %p2247_p4 }
   0xe   :  { %p2250_p7 = pnand %p2249_p6, %p2243_p3 }
  0x10   :  { %2253 = shalt.err (!%p2250_p7)
}
  0x11   :  { %s2327_s15 = smov 256   ;;  %s2328_s16 = smov 16  }
  0x12   :  { %40 = dma.hbm_to_vmem [thread:$0]  %s2822_s1, 1024, %s35_s28, [#allocation6], %s2327_s15, %s2327_s15, %s2328_s16  }
  0x13   :  { %s2329_s19 = smov [#allocation2]   ;;  %s2254_s23 = scalar_lea.hbm %s2821_s0, 256 }
  0x14   :  { %s22_s20 = sshll.u32 %s2329_s19, 4  ;;  %p2255_p8 = scmp.ne.s32.totalorder %s2821_s0, %s2254_s23  ;;  %s23_s20 = int_to_ptr.vmem [resolvable:$true] %s22_s20 }
  0x15   :  { %p2258_p9 = scmp.lt.u32.totalorder %s2254_s23, %s2821_s0 }
  0x17   :  { %p2260_p10 = pnand %p2258_p9, %p2255_p8 }
  0x19   :  { %2263 = shalt.err (!%p2260_p10)
}
  0x1a   :  { %s2264_s29 = scalar_lea.vmem %s23_s20, 256  ;;  %p2269_p12 = scmp.lt.s32.totalorder %s23_s20, %s23_s20 }
  0x1b   :  { %p2265_p11 = scmp.ne.s32.totalorder %s23_s20, %s2264_s29  ;;  %p2270_p13 = scmp.lt.s32.totalorder %s2264_s29, %s2264_s29 }
  0x1d   :  { %p2271_p0 = por %p2270_p13, %p2269_p12 }
  0x1f   :  { %p2272_p1 = pnand %p2271_p0, %p2265_p11 }
  0x21   :  { %2275 = shalt.err (!%p2272_p1)
}
  0x22   :  { %s2330_s1 = smov 128   ;;  %s2331_s28 = smov 8  }
  0x23   :  { %28 = dma.hbm_to_vmem [thread:$0]  %s2821_s0, 256, %s23_s20, [#allocation3], %s2330_s1, %s2330_s1, %s2331_s28  }
  0x24   :  { %s2332_s10 = smov [#allocation7]   ;;  %s2276_s14 = scalar_lea.hbm %s2824_s3, 512 }
  0x25   :  { %s48_s11 = sshll.u32 %s2332_s10, 4  ;;  %p2277_p2 = scmp.ne.s32.totalorder %s2824_s3, %s2276_s14  ;;  %s49_s11 = int_to_ptr.vmem [resolvable:$true] %s48_s11 }
  0x26   :  { %p2280_p3 = scmp.lt.u32.totalorder %s2276_s14, %s2824_s3 }
  0x28   :  { %p2282_p4 = pnand %p2280_p3, %p2277_p2 }
  0x2a   :  { %2285 = shalt.err (!%p2282_p4)
}
  0x2b   :  { %s2286_s19 = scalar_lea.vmem %s49_s11, 512  ;;  %p2291_p6 = scmp.lt.s32.totalorder %s49_s11, %s49_s11 }
  0x2c   :  { %p2287_p5 = scmp.ne.s32.totalorder %s49_s11, %s2286_s19  ;;  %p2292_p7 = scmp.lt.s32.totalorder %s2286_s19, %s2286_s19 }
  0x2e   :  { %p2293_p8 = por %p2292_p7, %p2291_p6 }
  0x30   :  { %p2294_p9 = pnand %p2293_p8, %p2287_p5 }
  0x32   :  { %2297 = shalt.err (!%p2294_p9)
}
  0x33   :  { %54 = dma.hbm_to_vmem [thread:$0]  %s2824_s3, 512, %s49_s11, [#allocation6], %s2330_s1, %s2330_s1, %s2331_s28  }
  0x34   :  { %2320 = dma.done.wait [#allocation3], 256  }
  0x35   :  { %2321 = vsyncadd [#allocation3], 4294967040 }
  0x36   :  { %2322 = dma.done.wait [#allocation6], 1536  }
  0x37   :  { %2323 = vsyncadd [#allocation6], 4294965760  ;;  %v82_v0 = vlaneseq  ;;  %v2333_v1 = vmov 0.0|0.0   ;;  %v2334_v2 = vmov 0.0   ;;  %vm2335_vm0 = vmmov 0   ;;  %v73_v4 = vld [vmem:[#allocation5 + $0x8] sm:$0xff] }
  0x38   :  { %2016 = vmatprep.subr.bf16.mxu1 %v2333_v1  ;;  %163 = vmatprep.mubr.f32.mxu0 %v2334_v2  ;;  %v75_v5 = vld [vmem:[#allocation5 + $0x18] sm:$0xff]  ;;  %v72_v6 = vld [vmem:[#allocation5] sm:$0xff]  ;;  %v2336_v7 = vmov 0.5   ;;  %v74_v10 = vld [vmem:[#allocation5 + $0x10] sm:$0xff]  ;;  %vm92_vm4 = vcmask 261120   ;;  %vm182_vm6 = vcmask 64512  }
  0x39   :  { %v2433_v3 = vand.u32 127, %v82_v0  ;;  %1928 = vmatprep.mubr.msk.f32.mxu1 %vm2335_vm0, %v2334_v2  ;;  %v2008_v9 = vpack.c.bf16 %v75_v5, %v73_v4  ;;  %v77_v11 = vld [vmem:[#allocation5 + $0x28] sm:$0xff]  ;;  %v79_v12 = vld [vmem:[#allocation5 + $0x38] sm:$0xff]  ;;  %v2010_v13 = vpack.c.bf16 %v74_v10, %v72_v6  ;;  %v76_v15 = vld [vmem:[#allocation5 + $0x20] sm:$0xff]  ;;  %v2468_v29 = vshrl.u32 %v82_v0, 7  ;;  %s2338_s23 = smov 64  }
  0x3a   :  { %v2012_v14 = vpack.c.bf16 %v79_v12, %v77_v11  ;;  %v78_v16 = vld [vmem:[#allocation5 + $0x30] sm:$0xff]  ;;  %v237_v17 = vld [vmem:[#allocation7] sm:$0xff]  ;;  %v238_v18 = vld [vmem:[#allocation7 + $0x8] sm:$0xff]  ;;  %v2337_v31 = vmov 1983009808   ;;  %s2339_s24 = smov 32  }
  0x3b   :  { %vm187_vm1 = vcmp.ge.s32.totalorder %v2433_v3, 64  ;;  %vm188_vm2 = vcmp.lt.s32.totalorder %v2433_v3, 96  ;;  %2009 = vmatprep.subr.bf16.mxu0 %v2008_v9  ;;  %v239_v20 = vld [vmem:[#allocation7 + $0x10] sm:$0xff]  ;;  %v2014_v21 = vpack.c.bf16 %v78_v16, %v76_v15  ;;  %v240_v23 = vld [vmem:[#allocation7 + $0x18] sm:$0xff]  ;;  %v2471_v30 = vsub.s32 0, %v2468_v29  ;;  %s2340_s29 = smov 96  }
  0x3c   :  { %vm189_vm3 = vmand %vm187_vm1, %vm188_vm2  ;;  %2011 = vmatpush1.bf16.msra.mxu0 %v2010_v13  ;;  %v70_v27 = vld [vmem:[#allocation2] sm:$0xff]  ;;  %v197_v32 = vunpack.c.l.s4 %v2337_v31  ;;  %v88_v34 = vsub.s32 1, %v2468_v29  ;;  %v71_v58 = vld [vmem:[#allocation2 + $0x8] sm:$0xff]  ;;  %vm247_vm8 = vcmp.eq.s32.totalorder %v2468_v29, 2  ;;  %vm385_vm9 = vcmask 257024   ;;  %s2344_s9 = smov 1  }
  0x3d   :  { %v2440_v8 = vsel %vm189_vm3, 1.0, %v2336_v7  ;;  %2013 = vmatprep.subr.bf16.mxu0 %v2012_v14  ;;  %v80_v33 = vld [vmem:[%s2823_s2] sm:$0x3]  ;;  %vm249_vm10 = vcmp.eq.s32.totalorder %v2433_v3, 2  ;;  %vm456_vm11 = vcmask 1044484   ;;  %vm459_vm12 = vcmask 4099  }
  0x3e   :  { %v241_v19 = vmul.f32 %v237_v17, %v2440_v8  ;;  %v242_v22 = vmul.f32 %v238_v18, %v2440_v8  ;;  %v243_v24 = vmul.f32 %v239_v20, %v2440_v8  ;;  %v244_v25 = vmul.f32 %v240_v23, %v2440_v8  ;;  %s2345_s10 = smov 4   ;;  %s2346_s11 = smov 5  }
  0x3f   :  { %v2478_v35 = vrot.slane %v80_v33, %v2471_v30  ;;  %v198_v36 = vunpack.c.0.s8 %v197_v32  ;;  %v89_v37 = vrot.slane %v80_v33, %v88_v34  ;;  %s2347_s12 = smov 6   ;;  %vm661_vm13 = vcmask 12299   ;;  %s2348_s13 = smov 7  }
  0x40   :  { %v2446_v26 = vpack.c.bf16 %v242_v22, %v241_v19  ;;  %2015 = vmatpush1.bf16.msra.mxu0 %v2014_v21  ;;  %v2449_v28 = vpack.c.bf16 %v244_v25, %v243_v24  ;;  %vm859_vm14 = vcmask 20499   ;;  %vm1057_vm15 = vcmask 28699   ;;  %s2349_s14 = smov [#allocation8]  }
  0x41   :  { %2022 = vmatprep.subr.bf16.mxu0 %v2333_v1  ;;  %v2482_v41 = vsub.s32 %v198_v36, %v2468_v29  ;;  %vm1453_vm1 = vcmask 45099   ;;  %vm1651_vm2 = vcmask 53299   ;;  %s1859_s15 = sshll.u32 %s2349_s14, 4  ;;  %vm1849_vm3 = vcmask 61499   ;;  %s1860_s15 = int_to_ptr.vmem [resolvable:$true] %s1859_s15 }
  0x42   :  { %2018 = vmatpush3.bf16.msra.mxu1 %v2446_v26  ;;  %s2298_s16 = scalar_lea.vmem %s1860_s15, 32  ;;  %p2303_p11 = scmp.lt.s32.totalorder %s1860_s15, %s1860_s15 }
  0x43   :  { %2019 = vmatprep.subr.bf16.mxu1 %v2333_v1  ;;  %1871 = vmatmul.mubr.msk.f32.vlgmr.msra.gmra.mrb[0].mxu0 %vm92_vm4, %v70_v27  ;;  %p2299_p10 = scmp.ne.s32.totalorder %s1860_s15, %s2298_s16  ;;  %p2304_p12 = scmp.lt.s32.totalorder %s2298_s16, %s2298_s16 }
  0x44   :  { %169 = vmatprep.mubr.f32.mxu0 %v2334_v2  ;;  %2024 = vmatpush3.bf16.msra.mxu0 %v2446_v26 }
  0x45   :  { %2025 = vmatprep.subr.bf16.mxu0 %v2333_v1  ;;  %p2305_p13 = por %p2304_p12, %p2303_p11 }
  0x46   :  { %2021 = vmatpush3.bf16.msra.mxu1 %v2449_v28 }
  0x47   :  { %2028 = vmatprep.subr.bf16.mxu1 %v2333_v1  ;;  %1872 = vmatmul.mubr.msk.f32.gmra.mrb[2].mxu0 %vm92_vm4, %v71_v58  ;;  %p2306_p0 = pnand %p2305_p13, %p2299_p10 }
  0x48   :  { %2027 = vmatpush3.bf16.msra.mxu0 %v2449_v28  ;;  %1939 = vmatprep.mubr.msk.f32.mxu0 %vm2335_vm0, %v2334_v2 }
  0x49   :  { %1929 = vmatmul.mubr.f32.vlgmr.msra.gmra.mrb[0].mxu1 %v2334_v2  ;;  %2034 = vmatprep.subr.bf16.mxu0 %v2333_v1 }
  0x4a   :  { %2030 = vmatpush3.bf16.msra.mxu1 %v2446_v26  ;;  %1950 = vmatprep.mubr.msk.f32.mxu1 %vm2335_vm0, %v2334_v2 }
  0x4b   :  { %2031 = vmatprep.subr.bf16.mxu1 %v2333_v1 }
  0x4e   :  { %2033 = vmatpush3.bf16.msra.mxu1 %v2449_v28 }
  0x4f   :  { %2040 = vmatprep.subr.bf16.mxu1 %v2333_v1 }
 0x116   :  { %v165_v38 = vpop.f32.mrb[0].mxu0 }
 0x117   :  { %v166_v39 = vadd.f32 %v165_v38, %v2478_v35  ;;  %v167_v40 = vpop.f32.mrb[1].mxu0 }
 0x118   :  { %v168_v42 = vadd.f32 %v167_v40, %v89_v37 }
 0x119   :  { %v2485_v43 = vmul.f32 %v2440_v8, %v166_v39 }
 0x11a   :  { %vm176_vm5 = vcmp.ge.f32.partialorder %v168_v42, 0.0  ;;  %v178_v44 = vmul.f32 0.2, %v168_v42  ;;  %v2504_v63 = vpop.f32.mrb[2].mxu0 }
 0x11b   :  { %v202_v46 = vrot.slane %v2485_v43, %v2482_v41  ;;  %v173_v0 = vpop.f32.mrb[3].mxu0  ;;  %v195_v31 = vcombine.high %v2485_v43, %v2485_v43 }
 0x11c   :  { %v326_v45 = vpop.f32.mrb[0].mxu1  ;;  %v180_v48 = vsel %vm176_vm5, %v168_v42, %v178_v44  ;;  %v174_v4 = vadd.f32 %v173_v0, %v89_v37 }
 0x11d   :  { %v1930_v47 = vpop.f32.mrb[1].mxu1  ;;  %183 = vst.msk [vmem:[%s2828_s7] sm:$0xff] %vm182_vm6, %v180_v48  ;;  %v330_v49 = vadd.f32 %v326_v45, %v202_v46  ;;  %v210_v10 = vcombine.high %v202_v46, %v202_v46  ;;  %v209_v32 = vrot.slane %v195_v31, %v2482_v41 }
 0x11e   :  { %vm177_vm7 = vcmp.ge.f32.partialorder %v174_v4, 0.0  ;;  %v179_v5 = vmul.f32 0.2, %v174_v4 }
 0x11f   :  { %2088 = vtanh.f32 %v330_v49 }
 0x120   :  { %v181_v6 = vsel %vm177_vm7, %v174_v4, %v179_v5 }
 0x121   :  { %184 = vst.msk [vmem:[%s2828_s7 + $0x8] sm:$0xff] %vm182_vm6, %v181_v6 }
 0x129   :  { %v2089_v50 = vpop.eup %2088 }
 0x12a   :  { %336 = vrot.lane.b32.xlu0 %v2089_v50, %s2338_s23  ;;  %v332_v51 = vmul.f32 0.5, %v2089_v50 }
 0x12c   :  { %v333_v52 = vadd.f32 0.5, %v332_v51  ;;  %v211_v51 = vcombine.high %v209_v32, %v209_v32 }
 0x12e   :  { %v334_v55 = vmul.f32 0.0, %v333_v52 }
 0x19c   :  { %v337_v53 = vpop.permute.xlu0 %336 }
 0x19d   :  { %v339_v54 = vmul.f32 %v337_v53, %v333_v52 }
 0x19f   :  { %341 = vrot.lane.b32.xlu0 %v339_v54, %s2339_s24 }
 0x211   :  { %v342_v56 = vpop.permute.xlu0 %341 }
 0x212   :  { %v344_v57 = vadd.f32 %v342_v56, %v334_v55 }
 0x214   :  { %2090 = vtanh.f32 %v344_v57 }
 0x21e   :  { %v2091_v59 = vpop.eup %2090 }
 0x21f   :  { %347 = vrot.lane.b32.xlu1 %v2091_v59, %s2338_s23 }
 0x291   :  { %v348_v60 = vpop.permute.xlu1 %347 }
 0x292   :  { %v2499_v61 = vmul.f32 %v348_v60, %v333_v52 }
 0x294   :  { %v468_v62 = vrot.slane %v2499_v61, %v2482_v41 }
 0x296   :  { %469 = vrot.lane.b32.xlu1 %v468_v62, %s2339_s24 }
 0x308   :  { %v470_v9 = vpop.permute.xlu1 %469 }
 0x309   :  { %1940 = vmatmul.mubr.msk.f32.vlgmr.msra.gmra.mrb[4].mxu0 %vm92_vm4, %v470_v9 }
 0x30a   :  { %2036 = vmatpush3.bf16.msra.mxu0 %v2446_v26  ;;  %1961 = vmatprep.mubr.msk.f32.mxu0 %vm2335_vm0, %v2334_v2 }
 0x30b   :  { %2037 = vmatprep.subr.bf16.mxu0 %v2333_v1 }
 0x30e   :  { %2039 = vmatpush3.bf16.msra.mxu0 %v2449_v28 }
 0x30f   :  { %2046 = vmatprep.subr.bf16.mxu0 %v2333_v1 }
 0x3dc   :  { %v539_v11 = vpop.f32.mrb[4].mxu0 }
 0x3dd   :  { %v543_v12 = vadd.f32 %v539_v11, %v210_v10  ;;  %v1941_v13 = vpop.f32.mrb[5].mxu0  ;;  %v172_v11 = vadd.f32 %v2504_v63, %v2478_v35 }
 0x3df   :  { %2092 = vtanh.f32 %v543_v12  ;;  %v192_v12 = vmul.f32 %v2440_v8, %v172_v11 }
 0x3e1   :  { %v219_v13 = vrot.slane %v192_v12, %v2482_v41 }
 0x3e9   :  { %v2093_v14 = vpop.eup %2092 }
 0x3ea   :  { %549 = vrot.lane.b32.xlu0 %v2093_v14, %s2338_s23  ;;  %v545_v15 = vmul.f32 0.5, %v2093_v14 }
 0x3ec   :  { %v546_v16 = vadd.f32 0.5, %v545_v15 }
 0x3ee   :  { %v547_v19 = vmul.f32 %v546_v16, %v344_v57 }
 0x45c   :  { %v550_v17 = vpop.permute.xlu0 %549 }
 0x45d   :  { %v552_v18 = vmul.f32 %v550_v17, %v546_v16 }
 0x45f   :  { %554 = vrot.lane.b32.xlu1 %v552_v18, %s2339_s24 }
 0x4d1   :  { %v555_v20 = vpop.permute.xlu1 %554 }
 0x4d2   :  { %v557_v21 = vadd.f32 %v555_v20, %v547_v19 }
 0x4d4   :  { %2094 = vtanh.f32 %v557_v21 }
 0x4de   :  { %v2095_v22 = vpop.eup %2094 }
 0x4df   :  { %560 = vrot.lane.b32.xlu0 %v2095_v22, %s2338_s23 }
 0x551   :  { %v561_v23 = vpop.permute.xlu0 %560 }
 0x552   :  { %v2520_v24 = vmul.f32 %v561_v23, %v546_v16 }
 0x554   :  { %v670_v25 = vrot.slane %v2520_v24, %v2482_v41 }
 0x556   :  { %671 = vrot.lane.b32.xlu1 %v670_v25, %s2339_s24 }
 0x5c8   :  { %v672_v27 = vpop.permute.xlu1 %671 }
 0x5c9   :  { %1951 = vmatmul.mubr.msk.f32.vlgmr.msra.gmra.mrb[2].mxu1 %vm92_vm4, %v672_v27 }
 0x5ca   :  { %2042 = vmatpush3.bf16.msra.mxu1 %v2446_v26  ;;  %1972 = vmatprep.mubr.msk.f32.mxu1 %vm2335_vm0, %v2334_v2 }
 0x5cb   :  { %2043 = vmatprep.subr.bf16.mxu1 %v2333_v1 }
 0x5ce   :  { %2045 = vmatpush3.bf16.msra.mxu1 %v2449_v28 }
 0x5cf   :  { %2052 = vmatprep.subr.bf16.mxu1 %v2333_v1 }
 0x69c   :  { %v741_v33 = vpop.f32.mrb[2].mxu1 }
 0x69d   :  { %v745_v34 = vadd.f32 %v741_v33, %v209_v32  ;;  %v1952_v36 = vpop.f32.mrb[3].mxu1  ;;  %v227_v32 = vcombine.high %v219_v13, %v219_v13 }
 0x69f   :  { %2096 = vtanh.f32 %v745_v34 }
 0x6a9   :  { %v2097_v37 = vpop.eup %2096 }
 0x6aa   :  { %751 = vrot.lane.b32.xlu0 %v2097_v37, %s2338_s23  ;;  %v747_v38 = vmul.f32 0.5, %v2097_v37 }
 0x6ac   :  { %v748_v39 = vadd.f32 0.5, %v747_v38 }
 0x6ae   :  { %v749_v44 = vmul.f32 %v748_v39, %v557_v21 }
 0x71c   :  { %v752_v40 = vpop.permute.xlu0 %751 }
 0x71d   :  { %v754_v42 = vmul.f32 %v752_v40, %v748_v39 }
 0x71f   :  { %756 = vrot.lane.b32.xlu1 %v754_v42, %s2339_s24 }
 0x791   :  { %v757_v45 = vpop.permute.xlu1 %756 }
 0x792   :  { %v759_v46 = vadd.f32 %v757_v45, %v749_v44 }
 0x794   :  { %2098 = vtanh.f32 %v759_v46 }
 0x79e   :  { %v2099_v43 = vpop.eup %2098 }
 0x79f   :  { %762 = vrot.lane.b32.xlu0 %v2099_v43, %s2338_s23 }
 0x811   :  { %v763_v47 = vpop.permute.xlu0 %762 }
 0x812   :  { %v2538_v48 = vmul.f32 %v763_v47, %v748_v39  ;;  %v212_v47 = vcombine.high %v192_v12, %v192_v12 }
 0x814   :  { %v868_v49 = vrot.slane %v2538_v48, %v2482_v41 }
 0x816   :  { %869 = vrot.lane.b32.xlu1 %v868_v49, %s2339_s24  ;;  %v2592_v49 = vrot.slane %v212_v47, %v2482_v41 }
 0x888   :  { %v870_v50 = vpop.permute.xlu1 %869 }
 0x889   :  { %1962 = vmatmul.mubr.msk.f32.vlgmr.msra.gmra.mrb[6].mxu0 %vm92_vm4, %v870_v50 }
 0x88a   :  { %2048 = vmatpush3.bf16.msra.mxu0 %v2446_v26  ;;  %1983 = vmatprep.mubr.msk.f32.mxu0 %vm2335_vm0, %v2334_v2 }
 0x88b   :  { %2049 = vmatprep.subr.bf16.mxu0 %v2333_v1 }
 0x88e   :  { %2051 = vmatpush3.bf16.msra.mxu0 %v2449_v28 }
 0x88f   :  { %2058 = vmatprep.subr.bf16.mxu0 %v2333_v1 }
 0x95c   :  { %v939_v52 = vpop.f32.mrb[6].mxu0 }
 0x95d   :  { %v943_v53 = vadd.f32 %v939_v52, %v211_v51  ;;  %v1963_v54 = vpop.f32.mrb[7].mxu0 }
 0x95f   :  { %2100 = vtanh.f32 %v943_v53 }
 0x969   :  { %v2101_v55 = vpop.eup %2100 }
 0x96a   :  { %949 = vrot.lane.b32.xlu0 %v2101_v55, %s2338_s23  ;;  %v945_v56 = vmul.f32 0.5, %v2101_v55 }
 0x96c   :  { %v946_v57 = vadd.f32 0.5, %v945_v56 }
 0x96e   :  { %v947_v60 = vmul.f32 %v946_v57, %v759_v46 }
 0x9dc   :  { %v950_v58 = vpop.permute.xlu0 %949 }
 0x9dd   :  { %v952_v59 = vmul.f32 %v950_v58, %v946_v57 }
 0x9df   :  { %954 = vrot.lane.b32.xlu1 %v952_v59, %s2339_s24 }
 0xa51   :  { %v955_v62 = vpop.permute.xlu1 %954 }
 0xa52   :  { %v957_v0 = vadd.f32 %v955_v62, %v947_v60  ;;  %v248_v62 = vsel %vm247_vm8, 1.0, %v2336_v7 }
 0xa54   :  { %2102 = vtanh.f32 %v957_v0 }
 0xa5e   :  { %v2103_v4 = vpop.eup %2102 }
 0xa5f   :  { %960 = vrot.lane.b32.xlu0 %v2103_v4, %s2338_s23 }
 0xad1   :  { %v961_v5 = vpop.permute.xlu0 %960 }
 0xad2   :  { %v2553_v6 = vmul.f32 %v961_v5, %v946_v57 }
 0xad4   :  { %v1066_v9 = vrot.slane %v2553_v6, %v2482_v41 }
 0xad6   :  { %1067 = vrot.lane.b32.xlu1 %v1066_v9, %s2339_s24  ;;  %v2341_v9 = vmov 1966171168  }
 0xb48   :  { %v1068_v10 = vpop.permute.xlu1 %1067 }
 0xb49   :  { %1973 = vmatmul.mubr.msk.f32.vlgmr.msra.gmra.mrb[4].mxu1 %vm92_vm4, %v1068_v10  ;;  %v354_v10 = vunpack.c.l.s4 %v2341_v9 }
 0xb4a   :  { %2054 = vmatpush3.bf16.msra.mxu1 %v2446_v26  ;;  %1994 = vmatprep.mubr.msk.f32.mxu1 %vm2335_vm0, %v2334_v2 }
 0xb4b   :  { %2055 = vmatprep.subr.bf16.mxu1 %v2333_v1  ;;  %v355_v11 = vunpack.c.0.s8 %v354_v10 }
 0xb4d   :  { %v2609_v12 = vsub.s32 %v355_v11, %v2468_v29 }
 0xb4e   :  { %2057 = vmatpush3.bf16.msra.mxu1 %v2449_v28 }
 0xc1c   :  { %v1137_v14 = vpop.f32.mrb[4].mxu1 }
 0xc1d   :  { %v1141_v15 = vadd.f32 %v1137_v14, %v219_v13  ;;  %v1974_v16 = vpop.f32.mrb[5].mxu1 }
 0xc1f   :  { %2104 = vtanh.f32 %v1141_v15 }
 0xc29   :  { %v2105_v17 = vpop.eup %2104 }
 0xc2a   :  { %1147 = vrot.lane.b32.xlu0 %v2105_v17, %s2338_s23  ;;  %v1143_v18 = vmul.f32 0.5, %v2105_v17 }
 0xc2c   :  { %v1144_v19 = vadd.f32 0.5, %v1143_v18 }
 0xc2e   :  { %v1145_v22 = vmul.f32 %v1144_v19, %v957_v0  ;;  %v251_v0 = vld [vmem:[%s2825_s4] sm:$0xf] }
 0xc2f   :  { %v252_v5 = vmul.f32 %v251_v0, %v248_v62 }
 0xc9c   :  { %v1148_v20 = vpop.permute.xlu0 %1147 }
 0xc9d   :  { %v1150_v21 = vmul.f32 %v1148_v20, %v1144_v19 }
 0xc9f   :  { %1152 = vrot.lane.b32.xlu1 %v1150_v21, %s2339_s24 }
 0xd11   :  { %v1153_v23 = vpop.permute.xlu1 %1152 }
 0xd12   :  { %v1155_v35 = vadd.f32 %v1153_v23, %v1145_v22 }
 0xd14   :  { %2106 = vtanh.f32 %v1155_v35 }
 0xd1e   :  { %v2107_v8 = vpop.eup %2106 }
 0xd1f   :  { %1158 = vrot.lane.b32.xlu0 %v2107_v8, %s2338_s23 }
 0xd91   :  { %v1159_v63 = vpop.permute.xlu0 %1158 }
 0xd92   :  { %v2571_v25 = vmul.f32 %v1159_v63, %v1144_v19 }
 0xd94   :  { %v1264_v27 = vrot.slane %v2571_v25, %v2482_v41 }
 0xd96   :  { %1265 = vrot.lane.b32.xlu1 %v1264_v27, %s2339_s24 }
 0xe08   :  { %v1266_v31 = vpop.permute.xlu1 %1265 }
 0xe09   :  { %1984 = vmatmul.mubr.msk.f32.vlgmr.msra.gmra.mrb[8].mxu0 %vm92_vm4, %v1266_v31 }
 0xe0a   :  { %2060 = vmatpush3.bf16.msra.mxu0 %v2446_v26  ;;  %2005 = vmatprep.mubr.msk.f32.mxu0 %vm2335_vm0, %v2334_v2  ;;  %vm1255_vm0 = vcmask 36899  }
 0xe0b   :  { %2061 = vmatprep.subr.bf16.mxu0 %v2333_v1 }
 0xe0e   :  { %2063 = vmatpush3.bf16.msra.mxu0 %v2449_v28 }
 0xedc   :  { %v1335_v33 = vpop.f32.mrb[8].mxu0 }
 0xedd   :  { %v1339_v34 = vadd.f32 %v1335_v33, %v227_v32  ;;  %v1985_v36 = vpop.f32.mrb[9].mxu0 }
 0xedf   :  { %2108 = vtanh.f32 %v1339_v34 }
 0xee9   :  { %v2109_v37 = vpop.eup %2108 }
 0xeea   :  { %1345 = vrot.lane.b32.xlu0 %v2109_v37, %s2338_s23  ;;  %v1341_v38 = vmul.f32 0.5, %v2109_v37  ;;  %v250_v37 = vsel %vm249_vm10, 1.0, %v2336_v7 }
 0xeec   :  { %v1342_v39 = vadd.f32 0.5, %v1341_v38  ;;  %v253_v38 = vld [vmem:[%s2826_s5] sm:$0x1]  ;;  %s2342_s5 = smov 2  }
 0xeee   :  { %v1343_v26 = vmul.f32 %v1342_v39, %v1155_v35 }
 0xf5c   :  { %v1346_v40 = vpop.permute.xlu0 %1345 }
 0xf5d   :  { %v1348_v42 = vmul.f32 %v1346_v40, %v1342_v39  ;;  %v254_v40 = vmul.f32 %v253_v38, %v250_v37 }
 0xf5f   :  { %1350 = vrot.lane.b32.xlu1 %v1348_v42, %s2339_s24 }
 0xfd1   :  { %v1351_v2 = vpop.permute.xlu1 %1350 }
 0xfd2   :  { %v1353_v44 = vadd.f32 %v1351_v2, %v1343_v26  ;;  %v396_v2 = vrot.slane %v254_v40, %v2471_v30  ;;  %v2669_v40 = vsub.s32 3, %v2468_v29 }
 0xfd4   :  { %2110 = vtanh.f32 %v1353_v44 }
 0xfde   :  { %v2111_v1 = vpop.eup %2110 }
 0xfdf   :  { %1356 = vrot.lane.b32.xlu0 %v2111_v1, %s2338_s23  ;;  %v398_v1 = vmul.f32 0.0, %v396_v2 }
0x1051   :  { %v1357_v28 = vpop.permute.xlu0 %1356 }
0x1052   :  { %v2585_v45 = vmul.f32 %v1357_v28, %v1342_v39 }
0x1054   :  { %v1462_v46 = vrot.slane %v2585_v45, %v2482_v41 }
0x1056   :  { %1463 = vrot.lane.b32.xlu1 %v1462_v46, %s2339_s24 }
0x10c8   :  { %v1464_v43 = vpop.permute.xlu1 %1463 }
0x10c9   :  { %1995 = vmatmul.mubr.msk.f32.vlgmr.msra.gmra.mrb[6].mxu1 %vm92_vm4, %v1464_v43 }
0x119c   :  { %v1533_v50 = vpop.f32.mrb[6].mxu1 }
0x119d   :  { %v1537_v51 = vadd.f32 %v1533_v50, %v2592_v49  ;;  %v1996_v52 = vpop.f32.mrb[7].mxu1 }
0x119f   :  { %2112 = vtanh.f32 %v1537_v51 }
0x11a9   :  { %v2113_v53 = vpop.eup %2112 }
0x11aa   :  { %1543 = vrot.lane.b32.xlu0 %v2113_v53, %s2338_s23  ;;  %v1539_v54 = vmul.f32 0.5, %v2113_v53 }
0x11ac   :  { %v1540_v55 = vadd.f32 0.5, %v1539_v54 }
0x11ae   :  { %v1541_v58 = vmul.f32 %v1540_v55, %v1353_v44 }
0x121c   :  { %v1544_v56 = vpop.permute.xlu0 %1543 }
0x121d   :  { %v1546_v57 = vmul.f32 %v1544_v56, %v1540_v55 }
0x121f   :  { %1548 = vrot.lane.b32.xlu1 %v1546_v57, %s2339_s24 }
0x1291   :  { %v1549_v59 = vpop.permute.xlu1 %1548 }
0x1292   :  { %v2597_v60 = vadd.f32 %v1549_v59, %v1541_v58 }
0x1294   :  { %2114 = vtanh.f32 %v2597_v60 }
0x1295   :  { %2116 = vtanh.f32 %v2499_v61 }
0x1296   :  { %2118 = vtanh.f32 %v2520_v24 }
0x1297   :  { %2120 = vtanh.f32 %v2538_v48  ;;  %v255_v48 = vld [vmem:[%s2827_s6] sm:$0x1]  ;;  %s2343_s6 = smov 3  }
0x1298   :  { %v256_v42 = vmul.f32 %v255_v48, %v250_v37  ;;  %2122 = vtanh.f32 %v2553_v6 }
0x129a   :  { %v410_v44 = vrot.slane %v256_v42, %v2471_v30 }
0x129e   :  { %v2115_v4 = vpop.eup %2114 }
0x129f   :  { %1554 = vrot.lane.b32.xlu0 %v2115_v4, %s2338_s23  ;;  %v2117_v13 = vpop.eup %2116 }
0x12a0   :  { %v359_v14 = vrot.slane %v2117_v13, %v2609_v12  ;;  %v2119_v15 = vpop.eup %2118 }
0x12a1   :  { %v572_v19 = vrot.slane %v2119_v15, %v2609_v12  ;;  %v2121_v39 = vpop.eup %2120 }
0x12a2   :  { %v360_v18 = vcombine.high %v359_v14, %v359_v14  ;;  %v364_v20 = vrot.slane %v359_v14, %v2471_v30  ;;  %v774_v26 = vrot.slane %v2121_v39, %v2609_v12  ;;  %v2123_v53 = vpop.eup %2122 }
0x12a3   :  { %372 = vrot.lane.b32.xlu0 %v252_v5, %s2340_s29  ;;  %v573_v23 = vcombine.high %v572_v19, %v572_v19  ;;  %v577_v8 = vrot.slane %v572_v19, %v2471_v30  ;;  %v972_v54 = vrot.slane %v2123_v53, %v2609_v12 }
0x12a4   :  { %v368_v22 = vrot.slane %v360_v18, %v2471_v30  ;;  %v775_v3 = vcombine.high %v774_v26, %v774_v26  ;;  %v779_v46 = vrot.slane %v774_v26, %v2471_v30 }
0x12a5   :  { %v581_v63 = vrot.slane %v573_v23, %v2471_v30  ;;  %v977_v6 = vrot.slane %v972_v54, %v2471_v30 }
0x12a6   :  { %v783_v7 = vrot.slane %v775_v3, %v2471_v30 }
0x1311   :  { %v1555_v16 = vpop.permute.xlu0 %1554 }
0x1312   :  { %v2612_v17 = vmul.f32 %v1555_v16, %v1540_v55  ;;  %v973_v55 = vcombine.high %v972_v54, %v972_v54 }
0x1314   :  { %v1660_v61 = vrot.slane %v2612_v17, %v2482_v41  ;;  %v981_v56 = vrot.slane %v973_v55, %v2471_v30 }
0x1315   :  { %v2618_v24 = vpop.permute.xlu0 %372 }
0x1316   :  { %1661 = vrot.lane.b32.xlu1 %v1660_v61, %s2339_s24  ;;  %v375_v21 = vmul.f32 %v2618_v24, %v364_v20  ;;  %v376_v35 = vmul.f32 %v2618_v24, %v368_v22  ;;  %v584_v41 = vmul.f32 %v577_v8, %v2618_v24  ;;  %v585_v27 = vmul.f32 %v581_v63, %v2618_v24 }
0x1317   :  { %v787_v28 = vmul.f32 %v783_v7, %v2618_v24  ;;  %v786_v43 = vmul.f32 %v779_v46, %v2618_v24  ;;  %v985_v57 = vmul.f32 %v981_v56, %v2618_v24  ;;  %v984_v58 = vmul.f32 %v977_v6, %v2618_v24 }
0x1318   :  { %379 = vrot.lane.b32.xlu0 %v375_v21, %s2339_s24 }
0x131a   :  { %381 = vrot.lane.b32.xlu1 %v376_v35, %s2339_s24 }
0x131c   :  { %588 = vrot.lane.b32.xlu0 %v584_v41, %s2339_s24 }
0x131e   :  { %590 = vrot.lane.b32.xlu1 %v585_v27, %s2339_s24 }
0x1388   :  { %v1662_v31 = vpop.permute.xlu1 %1661 }
0x1389   :  { %2006 = vmatmul.mubr.msk.f32.vlgmr.msra.gmra.mrb[10].mxu0 %vm92_vm4, %v1662_v31 }
0x138a   :  { %v380_v32 = vpop.permute.xlu0 %379 }
0x138b   :  { %v386_v33 = vsel %vm385_vm9, %v380_v32, 0.0 }
0x138c   :  { %v382_v34 = vpop.permute.xlu1 %381  ;;  %387 = vadd.xlane.f32.xlu0 %v386_v33 }
0x138d   :  { %v389_v36 = vsel %vm385_vm9, %v382_v34, 0.0 }
0x138e   :  { %390 = vadd.xlane.f32.xlu1 %v389_v36  ;;  %v589_v50 = vpop.permute.xlu0 %588 }
0x138f   :  { %v594_v52 = vsel %vm385_vm9, %v589_v50, 0.0 }
0x1390   :  { %v591_v47 = vpop.permute.xlu1 %590 }
0x1391   :  { %v597_v51 = vsel %vm385_vm9, %v591_v47, 0.0 }
0x139f   :  { %412 = vbcast.lane.b32.xlu1 %v410_v44, 256 }
0x13a2   :  { %401 = vbcast.lane.b32.xlu0 %v398_v1, 256 }
0x13a3   :  { %792 = vrot.lane.b32.xlu1 %v787_v28, %s2339_s24 }
0x13a6   :  { %790 = vrot.lane.b32.xlu0 %v786_v43, %s2339_s24 }
0x13c5   :  { %598 = vadd.xlane.f32.xlu0 %v597_v51  ;;  %v228_v51 = vcombine.high %v2592_v49, %v2592_v49 }
0x13c7   :  { %595 = vadd.xlane.f32.xlu1 %v594_v52 }
0x13d8   :  { %990 = vrot.lane.b32.xlu1 %v985_v57, %s2339_s24 }
0x13db   :  { %609 = vbcast.lane.b32.xlu0 %v396_v2, 256 }
0x13df   :  { %988 = vrot.lane.b32.xlu0 %v984_v58, %s2339_s24 }
0x1419   :  { %v388_v59 = vpop.xlane.xlu0 %387 }
0x141b   :  { %v391_v62 = vpop.xlane.xlu1 %390 }
0x141d   :  { %v402_v0 = vpop.permute.xlu0 %401 }
0x141e   :  { %v404_v4 = vadd.f32 %v402_v0, %v388_v59  ;;  %v405_v5 = vadd.f32 %v402_v0, %v391_v62 }
0x141f   :  { %v2663_v9 = vpop.permute.xlu1 %412 }
0x1420   :  { %v415_v10 = vadd.f32 %v2663_v9, %v404_v4  ;;  %v416_v11 = vadd.f32 %v2663_v9, %v405_v5 }
0x1421   :  { %v791_v13 = vpop.permute.xlu0 %790 }
0x1422   :  { %v796_v14 = vsel %vm385_vm9, %v791_v13, 0.0  ;;  %2124 = vtanh.f32 %v415_v10 }
0x1423   :  { %797 = vadd.xlane.f32.xlu0 %v796_v14  ;;  %2126 = vtanh.f32 %v416_v11  ;;  %v793_v44 = vpop.permute.xlu1 %792 }
0x142c   :  { %v2125_v15 = vpop.eup %2124 }
0x142d   :  { %v2127_v16 = vpop.eup %2126  ;;  %v419_v18 = vmul.f32 0.5, %v2125_v15  ;;  %v427_v20 = vrot.slane %v2125_v15, 2 }
0x142e   :  { %v420_v19 = vmul.f32 0.5, %v2127_v16  ;;  %v428_v22 = vrot.slane %v2127_v16, 2 }
0x142f   :  { %v421_v61 = vadd.f32 0.5, %v419_v18 }
0x1430   :  { %v422_v21 = vadd.f32 0.5, %v420_v19 }
0x1431   :  { %v431_v23 = vmul.f32 %v427_v20, %v421_v61  ;;  %v423_v8 = vmul.f32 0.0, %v421_v61 }
0x1432   :  { %v432_v35 = vmul.f32 %v428_v22, %v422_v21  ;;  %v424_v63 = vmul.f32 0.0, %v422_v21 }
0x1433   :  { %v435_v41 = vrot.slane %v431_v23, 7 }
0x1434   :  { %v436_v27 = vrot.slane %v432_v35, 7 }
0x1435   :  { %v439_v31 = vadd.f32 %v435_v41, %v423_v8  ;;  %v799_v41 = vsel %vm385_vm9, %v793_v44, 0.0 }
0x1436   :  { %v440_v32 = vadd.f32 %v436_v27, %v424_v63 }
0x1437   :  { %2128 = vtanh.f32 %v439_v31 }
0x1438   :  { %2130 = vtanh.f32 %v440_v32 }
0x1441   :  { %v2129_v33 = vpop.eup %2128 }
0x1442   :  { %v2131_v34 = vpop.eup %2130  ;;  %v445_v36 = vrot.slane %v2129_v33, 6 }
0x1443   :  { %v446_v37 = vrot.slane %v2131_v34, 6 }
0x1444   :  { %v449_v38 = vmul.f32 %v445_v36, %v421_v61 }
0x1445   :  { %v450_v39 = vmul.f32 %v446_v37, %v422_v21 }
0x1446   :  { %v603_v1 = vrot.slane %v449_v38, %v2669_v40 }
0x1447   :  { %2132 = vtanh.f32 %v450_v39  ;;  %v607_v7 = vrot.slane %v450_v39, %v2669_v40 }
0x1448   :  { %2134 = vtanh.f32 %v449_v38 }
0x1451   :  { %v2133_v48 = vpop.eup %2132 }
0x1452   :  { %v599_v42 = vpop.xlane.xlu0 %598  ;;  %v455_v26 = vrot.slane %v2133_v48, 7  ;;  %v2135_v2 = vpop.eup %2134 }
0x1454   :  { %v457_v3 = vsel %vm456_vm11, %v455_v26, %v2135_v2  ;;  %v596_v43 = vpop.xlane.xlu1 %595 }
0x1455   :  { %460 = vst.msk [vmem:[#allocation8 - $0x3] sm:$0x18] %vm459_vm12, %v457_v3 }
0x1456   :  { %v2674_v28 = vpop.permute.xlu0 %609 }
0x1457   :  { %v612_v46 = vmul.f32 %v2674_v28, %v603_v1  ;;  %v613_v29 = vmul.f32 %v2674_v28, %v607_v7 }
0x1459   :  { %v614_v47 = vadd.f32 %v612_v46, %v596_v43  ;;  %v615_v50 = vadd.f32 %v613_v29, %v599_v42 }
0x145a   :  { %v989_v48 = vpop.permute.xlu0 %988 }
0x145b   :  { %v616_v52 = vadd.f32 %v614_v47, %v2663_v9  ;;  %v617_v53 = vadd.f32 %v615_v50, %v2663_v9  ;;  %v994_v47 = vsel %vm385_vm9, %v989_v48, 0.0 }
0x145c   :  { %v1731_v54 = vpop.f32.mrb[10].mxu0 }
0x145d   :  { %v1735_v55 = vadd.f32 %v1731_v54, %v228_v51  ;;  %v2007_v56 = vpop.f32.mrb[11].mxu0  ;;  %2136 = vtanh.f32 %v616_v52 }
0x145e   :  { %2138 = vtanh.f32 %v617_v53 }
0x145f   :  { %2140 = vtanh.f32 %v1735_v55 }
0x1467   :  { %v2137_v57 = vpop.eup %2136 }
0x1468   :  { %v2139_v6 = vpop.eup %2138  ;;  %v620_v58 = vmul.f32 0.5, %v2137_v57  ;;  %v628_v0 = vrot.slane %v2137_v57, 2 }
0x1469   :  { %v2682_v59 = vpop.eup %2140  ;;  %v621_v62 = vmul.f32 0.5, %v2139_v6  ;;  %v629_v5 = vrot.slane %v2139_v6, 2 }
0x146a   :  { %1741 = vrot.lane.b32.xlu1 %v2682_v59, %s2338_s23  ;;  %v622_v49 = vadd.f32 0.5, %v620_v58  ;;  %v991_v58 = vpop.permute.xlu1 %990 }
0x146b   :  { %v623_v4 = vadd.f32 0.5, %v621_v62 }
0x146c   :  { %v624_v10 = vmul.f32 %v622_v49, %v439_v31  ;;  %v632_v11 = vmul.f32 %v628_v0, %v622_v49 }
0x146d   :  { %v625_v13 = vmul.f32 %v623_v4, %v440_v32  ;;  %v633_v14 = vmul.f32 %v629_v5, %v623_v4 }
0x146e   :  { %v636_v15 = vrot.slane %v632_v11, 7 }
0x146f   :  { %v637_v16 = vrot.slane %v633_v14, 7 }
0x1470   :  { %v640_v18 = vadd.f32 %v636_v15, %v624_v10 }
0x1471   :  { %v2686_v19 = vadd.f32 %v637_v16, %v625_v13 }
0x1472   :  { %2142 = vtanh.f32 %v640_v18 }
0x1473   :  { %2144 = vtanh.f32 %v2686_v19 }
0x147c   :  { %v2143_v61 = vpop.eup %2142 }
0x147d   :  { %v2145_v20 = vpop.eup %2144  ;;  %v646_v21 = vrot.slane %v2143_v61, 6 }
0x147e   :  { %v647_v22 = vrot.slane %v2145_v20, 6 }
0x147f   :  { %v650_v23 = vmul.f32 %v646_v21, %v622_v49 }
0x1480   :  { %v651_v35 = vmul.f32 %v647_v22, %v623_v4  ;;  %v997_v4 = vsel %vm385_vm9, %v991_v58, 0.0 }
0x1481   :  { %v805_v39 = vrot.slane %v650_v23, %v2669_v40 }
0x1482   :  { %2146 = vtanh.f32 %v651_v35 }
0x1483   :  { %2148 = vtanh.f32 %v650_v23  ;;  %v810_v42 = vmul.f32 %v805_v39, %v2674_v28 }
0x1484   :  { %2150 = vtanh.f32 %v2571_v25 }
0x148c   :  { %v2147_v8 = vpop.eup %2146 }
0x148d   :  { %v656_v63 = vrot.slane %v2147_v8, 7  ;;  %v2149_v27 = vpop.eup %2148 }
0x148e   :  { %800 = vadd.xlane.f32.xlu1 %v799_v41  ;;  %v2151_v32 = vpop.eup %2150 }
0x148f   :  { %v2692_v31 = vsel %vm456_vm11, %v656_v63, %v2149_v27  ;;  %v1170_v33 = vrot.slane %v2151_v32, %v2609_v12 }
0x1491   :  { %v1171_v34 = vcombine.high %v1170_v33, %v1170_v33  ;;  %v1175_v25 = vrot.slane %v1170_v33, %v2471_v30 }
0x1493   :  { %v1179_v36 = vrot.slane %v1171_v34, %v2471_v30  ;;  %v1182_v38 = vmul.f32 %v1175_v25, %v2618_v24 }
0x1495   :  { %v1183_v37 = vmul.f32 %v1179_v36, %v2618_v24 }
0x149f   :  { %1188 = vrot.lane.b32.xlu1 %v1183_v37, %s2339_s24 }
0x14a3   :  { %1186 = vrot.lane.b32.xlu1 %v1182_v38, %s2339_s24 }
0x14b0   :  { %v798_v26 = vpop.xlane.xlu0 %797 }
0x14b1   :  { %v812_v2 = vadd.f32 %v810_v42, %v798_v26 }
0x14b3   :  { %v814_v44 = vadd.f32 %v812_v2, %v2663_v9 }
0x14b5   :  { %2152 = vtanh.f32 %v814_v44 }
0x14b6   :  { %2154 = vtanh.f32 %v2585_v45  ;;  %v1737_v45 = vmul.f32 0.5, %v2682_v59  ;;  %v809_v59 = vrot.slane %v651_v35, %v2669_v40 }
0x14b8   :  { %v2714_v62 = vadd.f32 0.5, %v1737_v45  ;;  %v811_v13 = vmul.f32 %v809_v59, %v2674_v28 }
0x14bf   :  { %v2153_v3 = vpop.eup %2152 }
0x14c0   :  { %v818_v1 = vmul.f32 0.5, %v2153_v3  ;;  %v826_v7 = vrot.slane %v2153_v3, 2  ;;  %v2155_v52 = vpop.eup %2154 }
0x14c1   :  { %v1368_v53 = vrot.slane %v2155_v52, %v2609_v12 }
0x14c2   :  { %v820_v46 = vadd.f32 0.5, %v818_v1 }
0x14c3   :  { %v1373_v55 = vrot.slane %v1368_v53, %v2471_v30  ;;  %v1369_v5 = vcombine.high %v1368_v53, %v1368_v53 }
0x14c4   :  { %v822_v29 = vmul.f32 %v820_v46, %v640_v18  ;;  %v830_v43 = vmul.f32 %v826_v7, %v820_v46 }
0x14c5   :  { %v1380_v57 = vmul.f32 %v1373_v55, %v2618_v24  ;;  %v1377_v10 = vrot.slane %v1369_v5, %v2471_v30 }
0x14c6   :  { %v834_v50 = vrot.slane %v830_v43, 7 }
0x14c7   :  { %995 = vadd.xlane.f32.xlu1 %v994_v47  ;;  %v1381_v11 = vmul.f32 %v1377_v10, %v2618_v24 }
0x14c8   :  { %v2706_v51 = vadd.f32 %v834_v50, %v822_v29 }
0x14ca   :  { %2156 = vtanh.f32 %v2706_v51 }
0x14cb   :  { %2158 = vtanh.f32 %v2612_v17 }
0x14d4   :  { %v2157_v54 = vpop.eup %2156 }
0x14d5   :  { %v844_v56 = vrot.slane %v2157_v54, 6  ;;  %v2159_v20 = vpop.eup %2158 }
0x14d6   :  { %v1566_v21 = vrot.slane %v2159_v20, %v2609_v12 }
0x14d7   :  { %v848_v6 = vmul.f32 %v844_v56, %v820_v46 }
0x14d8   :  { %1384 = vrot.lane.b32.xlu1 %v1380_v57, %s2339_s24  ;;  %v1571_v35 = vrot.slane %v1566_v21, %v2471_v30 }
0x14d9   :  { %v1003_v38 = vrot.slane %v848_v6, %v2669_v40 }
0x14da   :  { %v1578_v27 = vmul.f32 %v1571_v35, %v2618_v24 }
0x14db   :  { %v1008_v3 = vmul.f32 %v1003_v38, %v2674_v28 }
0x14dc   :  { %v1742_v49 = vpop.permute.xlu1 %1741 }
0x14dd   :  { %v1744_v0 = vmul.f32 %v1742_v49, %v2714_v62 }
0x14df   :  { %1746 = vrot.lane.b32.xlu0 %v1744_v0, %s2339_s24  ;;  %v1567_v0 = vcombine.high %v1566_v21, %v1566_v21 }
0x14e1   :  { %v1575_v10 = vrot.slane %v1567_v0, %v2471_v30 }
0x14fe   :  { %998 = vadd.xlane.f32.xlu0 %v997_v4 }
0x1514   :  { %1386 = vrot.lane.b32.xlu0 %v1381_v11, %s2339_s24 }
0x151b   :  { %v801_v14 = vpop.xlane.xlu1 %800 }
0x151c   :  { %v813_v15 = vadd.f32 %v811_v13, %v801_v14  ;;  %v1579_v13 = vmul.f32 %v1575_v10, %v2618_v24 }
0x151e   :  { %v815_v16 = vadd.f32 %v813_v15, %v2663_v9 }
0x151f   :  { %v1189_v18 = vpop.permute.xlu1 %1188 }
0x1520   :  { %2160 = vtanh.f32 %v815_v16  ;;  %v1195_v61 = vsel %vm385_vm9, %v1189_v18, 0.0 }
0x1521   :  { %1196 = vadd.xlane.f32.xlu1 %v1195_v61 }
0x1523   :  { %v1187_v42 = vpop.permute.xlu1 %1186 }
0x152a   :  { %v2161_v22 = vpop.eup %2160 }
0x152b   :  { %v819_v23 = vmul.f32 0.5, %v2161_v22  ;;  %v827_v8 = vrot.slane %v2161_v22, 2 }
0x152d   :  { %v821_v41 = vadd.f32 0.5, %v819_v23 }
0x152f   :  { %v823_v17 = vmul.f32 %v821_v41, %v2686_v19  ;;  %v831_v63 = vmul.f32 %v827_v8, %v821_v41  ;;  %v1739_v19 = vmul.f32 %v2714_v62, %v2597_v60 }
0x1531   :  { %v835_v32 = vrot.slane %v831_v63, 7 }
0x1532   :  { %1582 = vrot.lane.b32.xlu1 %v1578_v27, %s2339_s24 }
0x1533   :  { %v839_v33 = vadd.f32 %v835_v32, %v823_v17 }
0x1535   :  { %2162 = vtanh.f32 %v839_v33 }
0x153f   :  { %v2163_v34 = vpop.eup %2162 }
0x1540   :  { %v845_v36 = vrot.slane %v2163_v34, 6 }
0x1542   :  { %v849_v37 = vmul.f32 %v845_v36, %v821_v41 }
0x1544   :  { %2164 = vtanh.f32 %v849_v37  ;;  %v1007_v58 = vrot.slane %v849_v37, %v2669_v40 }
0x1545   :  { %2166 = vtanh.f32 %v848_v6  ;;  %v1192_v6 = vsel %vm385_vm9, %v1187_v42, 0.0 }
0x1546   :  { %v1009_v49 = vmul.f32 %v1007_v58, %v2674_v28 }
0x154e   :  { %v2165_v25 = vpop.eup %2164 }
0x154f   :  { %v854_v39 = vrot.slane %v2165_v25, 7  ;;  %v2167_v48 = vpop.eup %2166 }
0x1551   :  { %v1747_v26 = vpop.permute.xlu0 %1746  ;;  %v2736_v2 = vsel %vm456_vm11, %v854_v39, %v2167_v48 }
0x1552   :  { %v1749_v44 = vadd.f32 %v1747_v26, %v1739_v19 }
0x1554   :  { %2168 = vtanh.f32 %v1749_v44  ;;  %v996_v1 = vpop.xlane.xlu1 %995 }
0x1555   :  { %v1010_v7 = vadd.f32 %v1008_v3, %v996_v1 }
0x1557   :  { %v1012_v46 = vadd.f32 %v1010_v7, %v2663_v9 }
0x1558   :  { %v1385_v35 = vpop.permute.xlu1 %1384 }
0x1559   :  { %2170 = vtanh.f32 %v1012_v46  ;;  %v1390_v17 = vsel %vm385_vm9, %v1385_v35, 0.0 }
0x155e   :  { %v2169_v29 = vpop.eup %2168 }
0x155f   :  { %1752 = vrot.lane.b32.xlu0 %v2169_v29, %s2338_s23 }
0x1563   :  { %v2171_v43 = vpop.eup %2170 }
0x1564   :  { %v1016_v47 = vmul.f32 0.5, %v2171_v43  ;;  %v1024_v50 = vrot.slane %v2171_v43, 2 }
0x1566   :  { %v1018_v60 = vadd.f32 0.5, %v1016_v47 }
0x1568   :  { %v1020_v52 = vmul.f32 %v1018_v60, %v2706_v51  ;;  %v1028_v53 = vmul.f32 %v1024_v50, %v1018_v60 }
0x156a   :  { %v1032_v54 = vrot.slane %v1028_v53, 7 }
0x156c   :  { %v2742_v55 = vadd.f32 %v1032_v54, %v1020_v52 }
0x156e   :  { %2172 = vtanh.f32 %v2742_v55 }
0x1578   :  { %v2173_v56 = vpop.eup %2172 }
0x1579   :  { %v1042_v57 = vrot.slane %v2173_v56, 6 }
0x157b   :  { %v2745_v45 = vmul.f32 %v1042_v57, %v1018_v60 }
0x157e   :  { %1193 = vadd.xlane.f32.xlu0 %v1192_v6 }
0x158b   :  { %v999_v4 = vpop.xlane.xlu0 %998 }
0x158c   :  { %v1011_v51 = vadd.f32 %v1009_v49, %v999_v4 }
0x158e   :  { %v1013_v5 = vadd.f32 %v1011_v51, %v2663_v9 }
0x158f   :  { %v1387_v11 = vpop.permute.xlu0 %1386 }
0x1590   :  { %2174 = vtanh.f32 %v1013_v5  ;;  %v1393_v59 = vsel %vm385_vm9, %v1387_v11, 0.0 }
0x1591   :  { %1394 = vadd.xlane.f32.xlu1 %v1393_v59 }
0x1594   :  { %1584 = vrot.lane.b32.xlu0 %v1579_v13, %s2339_s24 }
0x159a   :  { %v2175_v14 = vpop.eup %2174 }
0x159b   :  { %v1017_v15 = vmul.f32 0.5, %v2175_v14  ;;  %v1025_v16 = vrot.slane %v2175_v14, 2 }
0x159d   :  { %v1019_v18 = vadd.f32 0.5, %v1017_v15 }
0x159f   :  { %v1021_v61 = vmul.f32 %v1019_v18, %v839_v33  ;;  %v1029_v20 = vmul.f32 %v1025_v16, %v1019_v18 }
0x15a1   :  { %v1033_v21 = vrot.slane %v1029_v20, 7 }
0x15a3   :  { %v1037_v22 = vadd.f32 %v1033_v21, %v1021_v61 }
0x15a5   :  { %2176 = vtanh.f32 %v1037_v22 }
0x15ae   :  { %v1197_v32 = vpop.xlane.xlu1 %1196 }
0x15af   :  { %v2177_v23 = vpop.eup %2176 }
0x15b0   :  { %v1043_v8 = vrot.slane %v2177_v23, 6 }
0x15b2   :  { %v1047_v41 = vmul.f32 %v1043_v8, %v1019_v18 }
0x15b3   :  { %1391 = vadd.xlane.f32.xlu0 %v1390_v17 }
0x15b4   :  { %2178 = vtanh.f32 %v1047_v41  ;;  %v1205_v63 = vrot.slane %v1047_v41, %v2669_v40 }
0x15b5   :  { %2180 = vtanh.f32 %v2745_v45 }
0x15b6   :  { %v1207_v27 = vmul.f32 %v1205_v63, %v2674_v28 }
0x15b8   :  { %v1209_v33 = vadd.f32 %v1207_v27, %v1197_v32 }
0x15ba   :  { %v1211_v34 = vadd.f32 %v1209_v33, %v2663_v9 }
0x15bc   :  { %2182 = vtanh.f32 %v1211_v34 }
0x15be   :  { %v2179_v36 = vpop.eup %2178 }
0x15bf   :  { %v1052_v37 = vrot.slane %v2179_v36, 7  ;;  %v2181_v25 = vpop.eup %2180 }
0x15c1   :  { %v2761_v38 = vsel %vm456_vm11, %v1052_v37, %v2181_v25 }
0x15c6   :  { %v2183_v39 = vpop.eup %2182 }
0x15c7   :  { %v1215_v48 = vmul.f32 0.5, %v2183_v39  ;;  %v1223_v42 = vrot.slane %v2183_v39, 2 }
0x15c9   :  { %v1217_v19 = vadd.f32 0.5, %v1215_v48 }
0x15cb   :  { %v1219_v26 = vmul.f32 %v1217_v19, %v1037_v22  ;;  %v1227_v44 = vmul.f32 %v1223_v42, %v1217_v19 }
0x15cd   :  { %v1231_v3 = vrot.slane %v1227_v44, 7 }
0x15cf   :  { %v1235_v1 = vadd.f32 %v1231_v3, %v1219_v26 }
0x15d1   :  { %v1753_v7 = vpop.permute.xlu0 %1752  ;;  %2184 = vtanh.f32 %v1235_v1 }
0x15d2   :  { %v1755_v46 = vmul.f32 %v1753_v7, %v2714_v62  ;;  %v1583_v62 = vpop.permute.xlu1 %1582 }
0x15d3   :  { %v1588_v6 = vsel %vm385_vm9, %v1583_v62, 0.0 }
0x15d4   :  { %2186 = vtanh.f32 %v1755_v46 }
0x15db   :  { %v2185_v29 = vpop.eup %2184 }
0x15dc   :  { %v1241_v43 = vrot.slane %v2185_v29, 6 }
0x15de   :  { %v2187_v47 = vpop.eup %2186  ;;  %v1245_v50 = vmul.f32 %v1241_v43, %v1217_v19 }
0x15df   :  { %v1764_v60 = vrot.slane %v2187_v47, %v2609_v12  ;;  %v1201_v12 = vrot.slane %v2745_v45, %v2669_v40 }
0x15e1   :  { %v1769_v52 = vrot.slane %v1764_v60, %v2471_v30  ;;  %v1765_v53 = vcombine.high %v1764_v60, %v1764_v60  ;;  %v1206_v58 = vmul.f32 %v1201_v12, %v2674_v28 }
0x15e3   :  { %v1776_v54 = vmul.f32 %v1769_v52, %v2618_v24  ;;  %v1773_v56 = vrot.slane %v1765_v53, %v2471_v30 }
0x15e5   :  { %1780 = vrot.lane.b32.xlu1 %v1776_v54, %s2339_s24  ;;  %v1777_v57 = vmul.f32 %v1773_v56, %v2618_v24  ;;  %v1403_v24 = vrot.slane %v1245_v50, %v2669_v40 }
0x15e7   :  { %1782 = vrot.lane.b32.xlu0 %v1777_v57, %s2339_s24  ;;  %v1405_v59 = vmul.f32 %v1403_v24, %v2674_v28 }
0x1606   :  { %1589 = vadd.xlane.f32.xlu0 %v1588_v6 }
0x160b   :  { %v1194_v49 = vpop.xlane.xlu0 %1193 }
0x160c   :  { %v1208_v0 = vadd.f32 %v1206_v58, %v1194_v49 }
0x160e   :  { %v1210_v4 = vadd.f32 %v1208_v0, %v2663_v9 }
0x160f   :  { %v1585_v30 = vpop.permute.xlu0 %1584 }
0x1610   :  { %2188 = vtanh.f32 %v1210_v4  ;;  %v1591_v51 = vsel %vm385_vm9, %v1585_v30, 0.0 }
0x1611   :  { %1592 = vadd.xlane.f32.xlu1 %v1591_v51 }
0x161a   :  { %v2189_v5 = vpop.eup %2188 }
0x161b   :  { %v1214_v10 = vmul.f32 0.5, %v2189_v5  ;;  %v1222_v11 = vrot.slane %v2189_v5, 2 }
0x161d   :  { %v1216_v13 = vadd.f32 0.5, %v1214_v10 }
0x161e   :  { %v1395_v45 = vpop.xlane.xlu1 %1394 }
0x161f   :  { %v1407_v14 = vadd.f32 %v1405_v59, %v1395_v45  ;;  %v1218_v15 = vmul.f32 %v1216_v13, %v2742_v55  ;;  %v1226_v16 = vmul.f32 %v1222_v11, %v1216_v13 }
0x1621   :  { %v1409_v18 = vadd.f32 %v1407_v14, %v2663_v9  ;;  %v1230_v61 = vrot.slane %v1226_v16, 7 }
0x1623   :  { %2190 = vtanh.f32 %v1409_v18  ;;  %v1234_v20 = vadd.f32 %v1230_v61, %v1218_v15 }
0x1625   :  { %2192 = vtanh.f32 %v1234_v20 }
0x1626   :  { %2194 = vtanh.f32 %v1245_v50 }
0x162d   :  { %v2191_v21 = vpop.eup %2190 }
0x162e   :  { %v1413_v22 = vmul.f32 0.5, %v2191_v21  ;;  %v1421_v8 = vrot.slane %v2191_v21, 2 }
0x162f   :  { %v2193_v23 = vpop.eup %2192 }
0x1630   :  { %v1415_v35 = vadd.f32 0.5, %v1413_v22  ;;  %v1240_v41 = vrot.slane %v2193_v23, 6  ;;  %v2195_v33 = vpop.eup %2194 }
0x1631   :  { %v1250_v36 = vrot.slane %v2195_v33, 7 }
0x1632   :  { %v1417_v17 = vmul.f32 %v1415_v35, %v1235_v1  ;;  %v1425_v63 = vmul.f32 %v1421_v8, %v1415_v35  ;;  %v1244_v27 = vmul.f32 %v1240_v41, %v1216_v13 }
0x1634   :  { %v1429_v32 = vrot.slane %v1425_v63, 7  ;;  %2196 = vtanh.f32 %v1244_v27  ;;  %v1399_v34 = vrot.slane %v1244_v27, %v2669_v40 }
0x1636   :  { %v2781_v55 = vadd.f32 %v1429_v32, %v1417_v17  ;;  %v1404_v25 = vmul.f32 %v1399_v34, %v2674_v28 }
0x163e   :  { %v2197_v37 = vpop.eup %2196 }
0x163f   :  { %v1251_v39 = vsel %vm456_vm11, %v1250_v36, %v2197_v37 }
0x1640   :  { %v1392_v48 = vpop.xlane.xlu0 %1391 }
0x1641   :  { %v1406_v42 = vadd.f32 %v1404_v25, %v1392_v48 }
0x1643   :  { %v1408_v19 = vadd.f32 %v1406_v42, %v2663_v9 }
0x1645   :  { %2198 = vtanh.f32 %v1408_v19 }
0x1646   :  { %2200 = vtanh.f32 %v2781_v55 }
0x164f   :  { %v2199_v26 = vpop.eup %2198 }
0x1650   :  { %v1412_v44 = vmul.f32 0.5, %v2199_v26  ;;  %v1420_v1 = vrot.slane %v2199_v26, 2  ;;  %v2201_v52 = vpop.eup %2200 }
0x1651   :  { %v1439_v54 = vrot.slane %v2201_v52, 6 }
0x1652   :  { %v1414_v3 = vadd.f32 0.5, %v1412_v44 }
0x1653   :  { %v1443_v56 = vmul.f32 %v1439_v54, %v1415_v35 }
0x1654   :  { %v1416_v7 = vmul.f32 %v1414_v3, %v1234_v20  ;;  %v1424_v46 = vmul.f32 %v1420_v1, %v1414_v3 }
0x1655   :  { %v1601_v24 = vrot.slane %v1443_v56, %v2669_v40 }
0x1656   :  { %v1428_v29 = vrot.slane %v1424_v46, 7 }
0x1657   :  { %v1781_v43 = vpop.permute.xlu1 %1780 }
0x1658   :  { %v1432_v47 = vadd.f32 %v1428_v29, %v1416_v7  ;;  %v1786_v50 = vsel %vm385_vm9, %v1781_v43, 0.0 }
0x1659   :  { %v1783_v60 = vpop.permute.xlu0 %1782  ;;  %1787 = vadd.xlane.f32.xlu1 %v1786_v50 }
0x165a   :  { %2202 = vtanh.f32 %v1432_v47  ;;  %v1789_v53 = vsel %vm385_vm9, %v1783_v60, 0.0 }
0x165b   :  { %1790 = vadd.xlane.f32.xlu0 %v1789_v53  ;;  %2204 = vtanh.f32 %v1443_v56 }
0x1664   :  { %v2203_v57 = vpop.eup %2202 }
0x1665   :  { %v1438_v62 = vrot.slane %v2203_v57, 6  ;;  %v2205_v12 = vpop.eup %2204 }
0x1666   :  { %v1448_v58 = vrot.slane %v2205_v12, 7 }
0x1667   :  { %v1442_v6 = vmul.f32 %v1438_v62, %v1414_v3 }
0x1669   :  { %2206 = vtanh.f32 %v1442_v6  ;;  %v1597_v4 = vrot.slane %v1442_v6, %v2669_v40 }
0x166a   :  { %856 = vrot.lane.b32.xlu1 %v2736_v2, %s2342_s5 }
0x166b   :  { %v1602_v30 = vmul.f32 %v1597_v4, %v2674_v28 }
0x166e   :  { %1054 = vrot.lane.b32.xlu1 %v2761_v38, %s2343_s6 }
0x1671   :  { %658 = vrot.lane.b32.xlu0 %v2692_v31, %s2344_s9  ;;  %v1603_v31 = vmul.f32 %v1601_v24, %v2674_v28 }
0x1673   :  { %v2207_v49 = vpop.eup %2206 }
0x1674   :  { %v1449_v0 = vsel %vm456_vm11, %v1448_v58, %v2207_v49 }
0x1675   :  { %1252 = vrot.lane.b32.xlu0 %v1251_v39, %s2345_s10  ;;  %1450 = vrot.lane.b32.xlu1 %v1449_v0, %s2346_s11 }
0x1693   :  { %v1590_v2 = vpop.xlane.xlu0 %1589 }
0x1694   :  { %v1604_v51 = vadd.f32 %v1602_v30, %v1590_v2 }
0x1696   :  { %v1606_v38 = vadd.f32 %v1604_v51, %v2663_v9 }
0x1698   :  { %2208 = vtanh.f32 %v1606_v38 }
0x169e   :  { %v1593_v5 = vpop.xlane.xlu1 %1592 }
0x169f   :  { %v1605_v10 = vadd.f32 %v1603_v31, %v1593_v5 }
0x16a1   :  { %v1607_v11 = vadd.f32 %v1605_v10, %v2663_v9 }
0x16a2   :  { %v2209_v59 = vpop.eup %2208 }
0x16a3   :  { %v1610_v13 = vmul.f32 0.5, %v2209_v59  ;;  %2210 = vtanh.f32 %v1607_v11  ;;  %v1618_v14 = vrot.slane %v2209_v59, 2 }
0x16a5   :  { %v1612_v45 = vadd.f32 0.5, %v1610_v13 }
0x16a7   :  { %v1622_v15 = vmul.f32 %v1618_v14, %v1612_v45  ;;  %v1614_v61 = vmul.f32 %v1612_v45, %v1432_v47 }
0x16a9   :  { %v1626_v16 = vrot.slane %v1622_v15, 7 }
0x16ab   :  { %v1630_v21 = vadd.f32 %v1626_v16, %v1614_v61 }
0x16ad   :  { %v2211_v18 = vpop.eup %2210  ;;  %2212 = vtanh.f32 %v1630_v21 }
0x16ae   :  { %v1611_v20 = vmul.f32 0.5, %v2211_v18  ;;  %v1619_v23 = vrot.slane %v2211_v18, 2 }
0x16b0   :  { %v1613_v22 = vadd.f32 0.5, %v1611_v20 }
0x16b2   :  { %v1623_v35 = vmul.f32 %v1619_v23, %v1613_v22  ;;  %v1615_v8 = vmul.f32 %v1613_v22, %v2781_v55 }
0x16b4   :  { %v1627_v41 = vrot.slane %v1623_v35, 7 }
0x16b6   :  { %v1631_v17 = vadd.f32 %v1627_v41, %v1615_v8 }
0x16b7   :  { %v2213_v63 = vpop.eup %2212 }
0x16b8   :  { %2214 = vtanh.f32 %v1631_v17  ;;  %v1636_v27 = vrot.slane %v2213_v63, 6 }
0x16ba   :  { %v1640_v34 = vmul.f32 %v1636_v27, %v1612_v45 }
0x16bc   :  { %v1795_v55 = vrot.slane %v1640_v34, %v2669_v40 }
0x16be   :  { %v1800_v19 = vmul.f32 %v1795_v55, %v2674_v28 }
0x16c2   :  { %v2215_v32 = vpop.eup %2214 }
0x16c3   :  { %v1637_v33 = vrot.slane %v2215_v32, 6 }
0x16c5   :  { %v1641_v36 = vmul.f32 %v1637_v33, %v1613_v22 }
0x16c7   :  { %2216 = vtanh.f32 %v1641_v36  ;;  %v1799_v42 = vrot.slane %v1641_v36, %v2669_v40 }
0x16c8   :  { %2218 = vtanh.f32 %v1640_v34 }
0x16c9   :  { %v1801_v3 = vmul.f32 %v1799_v42, %v2674_v28 }
0x16d1   :  { %v2217_v37 = vpop.eup %2216 }
0x16d2   :  { %v1646_v25 = vrot.slane %v2217_v37, 7  ;;  %v2219_v39 = vpop.eup %2218 }
0x16d4   :  { %v1647_v48 = vsel %vm456_vm11, %v1646_v25, %v2219_v39 }
0x16d5   :  { %1648 = vrot.lane.b32.xlu0 %v1647_v48, %s2347_s12 }
0x16e6   :  { %v1788_v26 = vpop.xlane.xlu1 %1787 }
0x16e7   :  { %v1802_v44 = vadd.f32 %v1800_v19, %v1788_v26 }
0x16e8   :  { %v1791_v1 = vpop.xlane.xlu0 %1790 }
0x16e9   :  { %v1804_v7 = vadd.f32 %v1802_v44, %v2663_v9  ;;  %v1803_v46 = vadd.f32 %v1801_v3, %v1791_v1 }
0x16ea   :  { %v857_v29 = vpop.permute.xlu1 %856 }
0x16eb   :  { %2220 = vtanh.f32 %v1804_v7  ;;  %v1805_v43 = vadd.f32 %v1803_v46, %v2663_v9 }
0x16ec   :  { %v659_v47 = vpop.permute.xlu0 %658 }
0x16ed   :  { %2222 = vtanh.f32 %v1805_v43  ;;  %662 = vst.msk [vmem:[#allocation8 - $0x3] sm:$0x18] %vm661_vm13, %v659_v47 }
0x16ee   :  { %860 = vst.msk [vmem:[#allocation8 - $0x3] sm:$0x18] %vm859_vm14, %v857_v29  ;;  %v1055_v40 = vpop.permute.xlu1 %1054 }
0x16ef   :  { %1058 = vst.msk [vmem:[#allocation8 - $0x3] sm:$0x18] %vm1057_vm15, %v1055_v40 }
0x16f0   :  { %v1253_v50 = vpop.permute.xlu0 %1252 }
0x16f1   :  { %1256 = vst.msk [vmem:[#allocation8 - $0x3] sm:$0x18] %vm1255_vm0, %v1253_v50 }
0x16f2   :  { %v1451_v28 = vpop.permute.xlu1 %1450 }
0x16f3   :  { %1454 = vst.msk [vmem:[#allocation8 - $0x3] sm:$0x18] %vm1453_vm1, %v1451_v28 }
0x16f5   :  { %v2221_v60 = vpop.eup %2220 }
0x16f6   :  { %v1808_v52 = vmul.f32 0.5, %v2221_v60  ;;  %v1816_v56 = vrot.slane %v2221_v60, 2 }
0x16f7   :  { %v2223_v53 = vpop.eup %2222 }
0x16f8   :  { %v1810_v54 = vadd.f32 0.5, %v1808_v52  ;;  %v1809_v9 = vmul.f32 0.5, %v2223_v53  ;;  %v1817_v62 = vrot.slane %v2223_v53, 2 }
0x16fa   :  { %v1820_v57 = vmul.f32 %v1816_v56, %v1810_v54  ;;  %v1811_v6 = vadd.f32 0.5, %v1809_v9  ;;  %v1812_v12 = vmul.f32 %v1810_v54, %v1630_v21 }
0x16fc   :  { %v1824_v58 = vrot.slane %v1820_v57, 7  ;;  %v1821_v49 = vmul.f32 %v1817_v62, %v1811_v6  ;;  %v1813_v4 = vmul.f32 %v1811_v6, %v1631_v17 }
0x16fe   :  { %v1828_v0 = vadd.f32 %v1824_v58, %v1812_v12  ;;  %v1825_v30 = vrot.slane %v1821_v49, 7 }
0x1700   :  { %2224 = vtanh.f32 %v1828_v0  ;;  %v1829_v2 = vadd.f32 %v1825_v30, %v1813_v4 }
0x1702   :  { %2226 = vtanh.f32 %v1829_v2 }
0x170a   :  { %v2225_v51 = vpop.eup %2224 }
0x170b   :  { %v1834_v38 = vrot.slane %v2225_v51, 6 }
0x170c   :  { %v2227_v24 = vpop.eup %2226 }
0x170d   :  { %v1835_v31 = vrot.slane %v2227_v24, 6  ;;  %v1838_v5 = vmul.f32 %v1834_v38, %v1810_v54 }
0x170f   :  { %v1839_v10 = vmul.f32 %v1835_v31, %v1811_v6 }
0x1711   :  { %2228 = vtanh.f32 %v1839_v10 }
0x1712   :  { %2230 = vtanh.f32 %v1838_v5 }
0x171b   :  { %v2229_v11 = vpop.eup %2228 }
0x171c   :  { %v1844_v59 = vrot.slane %v2229_v11, 7  ;;  %v2231_v13 = vpop.eup %2230 }
0x171e   :  { %v1845_v45 = vsel %vm456_vm11, %v1844_v59, %v2231_v13 }
0x171f   :  { %1846 = vrot.lane.b32.xlu1 %v1845_v45, %s2348_s13 }
0x1747   :  { %v1649_v14 = vpop.permute.xlu0 %1648 }
0x1748   :  { %1652 = vst.msk [vmem:[#allocation8 - $0x3] sm:$0x18] %vm1651_vm2, %v1649_v14 }
0x1791   :  { %v1847_v15 = vpop.permute.xlu1 %1846 }
0x1792   :  { %1850 = vst.msk [vmem:[#allocation8 - $0x3] sm:$0x18] %vm1849_vm3, %v1847_v15 }
0x1793   :  { %2309 = shalt.err (!%p2306_p0)
}
0x1794   :  { %s2310_s19 = scalar_lea.hbm %s2829_s8, 32 }
0x1795   :  { %p2311_p1 = scmp.ne.s32.totalorder %s2829_s8, %s2310_s19  ;;  %p2314_p2 = scmp.lt.u32.totalorder %s2310_s19, %s2829_s8 }
0x1797   :  { %p2316_p3 = pnand %p2314_p2, %p2311_p1 }
0x1799   :  { %2319 = shalt.err (!%p2316_p3)
}
0x179a   :  { %1862 = dma.vmem_to_hbm [thread:$0]  %s1860_s15, 32, %s2829_s8, [#allocation4]  }
0x179b   :  { %2324 = dma.done.wait [#allocation4], 32  }
0x179c   :  { %2325 = vsyncadd [#allocation4], 4294967264 }
0x179d   :  { %1868 = vsyncpa [#allocation3], 1 }
0x179e   :  { %1869 = vsyncpa [#allocation6], 1 }
0x179f   :  { %1870 = vsyncpa [#allocation4], 1 }

</bundles_post_ra>
